<compile_context>
chip_gen: v7x
topology: tpu7x:2x2x1
jax: 0.10.0
libtpu: 0.0.40
codegen_flags: <defaults>
</compile_context>

<pallas_src>
import functools

import numpy as np
import jax
import jax.numpy as jnp
from jax import lax
from jax.experimental import pallas as pl
from jax.experimental.pallas import tpu as pltpu

_INV_SQRT2 = 0.7071067811865476      # 1/sqrt(2)
_INV_SQRT_2PI = 0.3989422804014327   # 1/sqrt(2*pi)

# XLA's f32 erf rational approximation (|err| ~ 1e-7), built only from
# mul/add/div/clamp so it is guaranteed to lower in Mosaic.
_ERF_ALPHA = (-2.72614225801306e-10, 2.77068142495902e-08,
              -2.10102402082508e-06, -5.69250639462346e-05,
              -7.34990630326855e-04, -2.954600547059e-03,
              -1.60960333262415e-02)
_ERF_BETA = (-1.45660718464996e-05, -2.13374055278905e-04,
             -1.68282697438203e-03, -7.37332916720468e-03,
             -1.42647390514189e-02)


def _erf(x):
  """Rational erf, Estrin evaluation (shorter dependence chain than Horner --
  the recurrence loop is latency-bound, so VALU depth matters)."""
  x = jnp.clip(x, -4.0, 4.0)
  t = x * x
  t2 = t * t
  t4 = t2 * t2
  a0, a1, a2, a3, a4, a5, a6 = _ERF_ALPHA
  b0, b1, b2, b3, b4 = _ERF_BETA
  p = (a6 + a5 * t) + (a4 + a3 * t) * t2 + ((a2 + a1 * t) + a0 * t2) * t4
  q = (b4 + b3 * t) + ((b2 + b1 * t) + b0 * t2) * t2
  return (p * x) / q


def _gelu_and_grad(a):
  """Exact (erf-based) GELU and its derivative, matching torch.nn.GELU()."""
  cdf = 0.5 * (1.0 + _erf(a * _INV_SQRT2))        # Phi(a)
  pdf = jnp.exp(-0.5 * a * a) * _INV_SQRT_2PI     # phi(a)
  return a * cdf, cdf + a * pdf


# ---------------------------------------------------------------------------
# Kernel 1: serial recurrence, K time steps per grid iteration.
# ---------------------------------------------------------------------------
def _recurrence_kernel(ax_ref, h0_ref, wh_ref, wg_ref, wst_ref, bsyn_ref,
                       hfin_ref, ghat_ref, cfin_ref, dfin_ref, pk_ref,
                       h_scr, *, k_steps, t_real, pad, unroll):
  c = pl.program_id(0)

  @pl.when(c == 0)
  def _():
    h_scr[...] = h0_ref[...]

  wh = wh_ref[...]
  wg = wg_ref[...]

  def step(i, h_prev):
    # Per-step serial chain: (h @ Wh) -> GELU -> (n @ Wgate) -> gate -> h.
    # The x @ Wx term is hoisted into the wrapper (precomputed ax).
    a = ax_ref[i] + jnp.dot(h_prev, wh, preferred_element_type=jnp.float32)
    n, dact = _gelu_and_grad(a)
    z = jnp.dot(n, wg, preferred_element_type=jnp.float32)
    g = 1.0 / (1.0 + jnp.exp(-z))                  # sigmoid gate
    h_new = g * h_prev + (1.0 - g)
    coeff = (h_prev - 1.0) * g * (1.0 - g)         # used by the Jacobian kernel
    # Single lane-dense store per step (4*dim lanes) instead of 4 masked ones.
    pk_ref[i] = jnp.concatenate([h_new, dact, g, coeff], axis=-1)
    if pad:
      # T was padded up to a multiple of k_steps: freeze the carry on the
      # padded tail steps (their streamed rows are sliced off in the wrapper).
      h_new = jnp.where(c * k_steps + i < t_real, h_new, h_prev)
    return h_new

  h_last = lax.fori_loop(0, k_steps, step, h_scr[...], unroll=unroll)
  h_scr[...] = h_last

  # Final-step work fused here (weights already resident, no second launch);
  # the resident outputs are written exactly once (last chunk).
  @pl.when(c == pl.num_programs(0) - 1)
  def _():
    hfin_ref[...] = h_last

    # SynGradBlock.synth: grad_hat = h @ W_synth^T + b_synth (W_synth passed
    # pre-transposed so this is a plain jnp.dot, no in-kernel transpose).
    ghat_ref[...] = (jnp.dot(h_last, wst_ref[...],
                             preferred_element_type=jnp.float32)
                     + bsyn_ref[...])

    # dh/dWh inputs -- module quirk: evaluated at the *updated* h and the
    # last real x.  Only the tiny (B, dim) factors are emitted here; the
    # (B, dim, dim, dim) expansion happens in kernel 3 (keeps kernel 1's
    # resident VMEM footprint tiny).
    a_f = (ax_ref[k_steps - 1 - pad]
           + jnp.dot(h_last, wh, preferred_element_type=jnp.float32))
    n_f, dact_f = _gelu_and_grad(a_f)
    z_f = jnp.dot(n_f, wg, preferred_element_type=jnp.float32)
    g_f = 1.0 / (1.0 + jnp.exp(-z_f))
    cfin_ref[...] = (h_last - 1.0) * g_f * (1.0 - g_f)
    dfin_ref[...] = dact_f


# ---------------------------------------------------------------------------
# Kernel 2: per-step Jacobians, parallel over (t, b) rows, lane-dense output.
# ---------------------------------------------------------------------------
def _jacobian_kernel(pk_ref, w2t_ref, sel_ref, diag_ref, jac_ref):
  # J[r, j*D+k] = g[r,j]*delta_jk + coeff[r,j] * sum_m dact[r,m]*Wgate[m,j]*Wh[k,m]
  # The (j, k) structure is folded into pre-built weights W2T / SELP / DIAG so
  # everything is a plain 2D matmul on the MXU and the store is unmasked
  # (last dim = D*D, a multiple of 128).
  # TODO(synk): for dim >= 128 switch to a row=(t,b,j) / col=k layout (drops
  # SELP/DIAG entirely and is already lane-dense) and shrink the row block.
  d = w2t_ref.shape[0]
  pk = pk_ref[...]                               # (RK, 4*D): [y, dact, g, coeff]
  dact = pk[:, d:2 * d]
  g = pk[:, 2 * d:3 * d]
  coeff = pk[:, 3 * d:]
  n2 = jnp.dot(dact, w2t_ref[...], preferred_element_type=jnp.float32)
  coeff_rep = jnp.dot(coeff, sel_ref[...], preferred_element_type=jnp.float32)
  diag_rep = jnp.dot(g, diag_ref[...], preferred_element_type=jnp.float32)
  jac_ref[...] = coeff_rep * n2 + diag_rep       # (RK, D*D)


# ---------------------------------------------------------------------------
# Kernel 3: dh/dWh outer-product expansion, parallel over (b, j) rows.
# ---------------------------------------------------------------------------
def _dwh_kernel(hrows_ref, cg_ref, selp_ref, selq_ref, out_ref):
  # out[(b,j), p*D+q] = h_final[b,p] * coeff_f[b,j]*Wgate[q,j]*dact_f[b,q]
  h_rep = jnp.dot(hrows_ref[...], selp_ref[...],
                  preferred_element_type=jnp.float32)      # (RK, D*D): h[b,p]
  cg_rep = jnp.dot(cg_ref[...], selq_ref[...],
                   preferred_element_type=jnp.float32)     # (RK, D*D): cg[b,j,q]
  out_ref[...] = h_rep * cg_rep


# ---------------------------------------------------------------------------
# Wrapper
# ---------------------------------------------------------------------------
def _pick_time_chunk(t, cap=64):
  """Time steps per grid iteration for the serial recurrence.

  Prefer a reasonably large divisor of T (no padded tail steps); otherwise pad
  T up to a multiple of `cap` so per-grid-step overhead stays amortized even
  for awkward / prime T.  Returns (K, pad)."""
  if t <= cap:
    return t, 0
  for c in range(cap, cap // 2 - 1, -1):
    if t % c == 0:
      return c, 0
  return cap, (-t) % cap


def _pick_row_block(rows, cap=512):
  """Row block for the (rows, dim^2) lane-dense kernels.

  Pads the row count instead of silently falling back to an unbounded
  full-array block.  Returns (row_block, pad)."""
  if rows <= cap:
    return rows, 0
  cap8 = cap - cap % 8
  for c in range(cap8, 7, -8):
    if rows % c == 0:
      return c, 0
  return cap8, (-rows) % cap8


def _vmem_limit(est_bytes):
  # Explicit scoped-VMEM limit (default is 32 MiB); clamp to 64 MiB so the
  # same number is also safe on v7x (64 MiB physical VMEM per TensorCore).
  return int(min(64 << 20, max(32 << 20, 2 * est_bytes)))


def syn_grad_block_forward(x, Wx, Wh, Wgate, Wsynth, bsynth, h0=None):
  """Pallas implementation of SynGradBlock.forward (take_grad=True).

  Returns (h_final, y, grad_hat, hidden_grads, dh_dWh):
    h_final      : (B, dim)
    y            : (B, T, dim)
    grad_hat     : (B, dim)            == synth(h_final)
    hidden_grads : (T, B, dim, dim)    per-step d h_t / d h_{t-1}
    dh_dWh       : (B, dim, dim, dim)
  """
  B, T, _ = x.shape
  dim = Wh.shape[0]
  dd = dim * dim
  if h0 is None:
    h0 = jnp.zeros((B, dim), jnp.float32)

  # ----- hoisted input projection (does not depend on h): one MXU-efficient
  # (T*B, in_dim) x (in_dim, dim) matmul instead of T tiny serial ones -------
  ax_tm = jnp.einsum('bti,id->tbd', x, Wx,
                     precision=jax.lax.Precision.HIGHEST)   # (T, B, dim)

  K, t_pad = _pick_time_chunk(T, cap=64)
  if t_pad:
    ax_tm = jnp.pad(ax_tm, ((0, t_pad), (0, 0), (0, 0)))
  T_full = T + t_pad
  nchunk = T_full // K
  unroll = min(K, 8)

  WsT = Wsynth.T
  bsyn2 = bsynth.reshape(1, dim)

  # ----- kernel 1: serial recurrence (K time steps per grid iteration) -----
  k1_vmem = 4 * (2 * K * B * dim + 2 * K * B * 4 * dim
                 + 2 * (3 * dim * dim + dim) + 9 * B * dim)
  (h_fin, grad_hat, coeff_f, dact_f, packed_tm) = pl.pallas_call(
      functools.partial(_recurrence_kernel, k_steps=K, t_real=T,
                        pad=t_pad, unroll=unroll),
      out_shape=(
          jax.ShapeDtypeStruct((B, dim), jnp.float32),             # h_final
          jax.ShapeDtypeStruct((B, dim), jnp.float32),             # grad_hat
          jax.ShapeDtypeStruct((B, dim), jnp.float32),             # coeff_f
          jax.ShapeDtypeStruct((B, dim), jnp.float32),             # dact_f
          jax.ShapeDtypeStruct((T_full, B, 4 * dim), jnp.float32),  # packed
      ),
      grid=(nchunk,),
      in_specs=[
          pl.BlockSpec((K, B, dim), lambda c: (c, 0, 0)),          # ax chunk
          pl.BlockSpec((B, dim), lambda c: (0, 0)),                # h0
          pl.BlockSpec((dim, dim), lambda c: (0, 0)),              # Wh
          pl.BlockSpec((dim, dim), lambda c: (0, 0)),              # Wgate
          pl.BlockSpec((dim, dim), lambda c: (0, 0)),              # Wsynth^T
          pl.BlockSpec((1, dim), lambda c: (0, 0)),                # b_synth
      ],
      out_specs=(
          pl.BlockSpec((B, dim), lambda c: (0, 0)),                # resident
          pl.BlockSpec((B, dim), lambda c: (0, 0)),                # resident
          pl.BlockSpec((B, dim), lambda c: (0, 0)),                # resident
          pl.BlockSpec((B, dim), lambda c: (0, 0)),                # resident
          pl.BlockSpec((K, B, 4 * dim), lambda c: (c, 0, 0)),      # streamed
      ),
      scratch_shapes=[pltpu.VMEM((B, dim), jnp.float32)],          # h carry
      compiler_params=pltpu.CompilerParams(
          dimension_semantics=("arbitrary",),                      # serial
          vmem_limit_bytes=_vmem_limit(k1_vmem)),
  )(ax_tm, h0, Wh, Wgate, WsT, bsyn2)
  # TODO(synk): on v7x (2 TensorCores) add a leading "parallel" grid axis over
  # batch blocks (recurrence is independent across batch) to halve the serial
  # wall-clock; skipped here since B is tiny and v5e/v6e have a single TC.

  # ----- kernel 2: per-step Jacobians, parallel over (t, b) rows ------------
  rows = T * B
  packed_rows = packed_tm[:T].reshape(rows, 4 * dim)
  RK, r_pad = _pick_row_block(rows, cap=512)
  if r_pad:
    packed_rows = jnp.pad(packed_rows, ((0, r_pad), (0, 0)))
  rows_full = rows + r_pad

  # Folded weights (built once, outside the kernels):
  #   W2T[m, j*D+k]   = Wgate[m, j] * Wh[k, m]      (the m-contraction weight)
  #   SELP[m, p*D+q]  = delta(m, p)                 (replicate along q)
  #   SELQ[m, p*D+q]  = delta(m, q)                 (replicate along p)
  #   DIAG[j', j*D+k] = delta(j', j) * delta(j, k)  (puts the gate on the diag)
  W2T = (Wgate[:, :, None] * Wh.T[:, None, :]).reshape(dim, dd)
  eye = jnp.eye(dim, dtype=jnp.float32)
  SELP = jnp.repeat(eye, dim, axis=1)
  SELQ = jnp.tile(eye, (1, dim))
  idx = jnp.arange(dim)
  DIAG = jnp.zeros((dim, dd), jnp.float32).at[idx, idx * dim + idx].set(1.0)

  k2_vmem = 4 * (2 * RK * 4 * dim + 2 * RK * dd + 2 * 3 * dim * dd)
  jac2 = pl.pallas_call(
      _jacobian_kernel,
      out_shape=jax.ShapeDtypeStruct((rows_full, dd), jnp.float32),
      grid=(rows_full // RK,),
      in_specs=[
          pl.BlockSpec((RK, 4 * dim), lambda r: (r, 0)),
          pl.BlockSpec((dim, dd), lambda r: (0, 0)),
          pl.BlockSpec((dim, dd), lambda r: (0, 0)),
          pl.BlockSpec((dim, dd), lambda r: (0, 0)),
      ],
      out_specs=pl.BlockSpec((RK, dd), lambda r: (r, 0)),
      compiler_params=pltpu.CompilerParams(
          dimension_semantics=("parallel",),
          vmem_limit_bytes=_vmem_limit(k2_vmem)),
  )(packed_rows, W2T, SELP, DIAG)
  if r_pad:
    jac2 = jac2[:rows]
  hidden_grads = jac2.reshape(T, B, dim, dim)

  # ----- kernel 3: dh/dWh expansion, parallel over (b, j) rows --------------
  # cg[b, j, q] = coeff_f[b, j] * Wgate[q, j] * dact_f[b, q]   (tiny, XLA)
  cg2 = (coeff_f[:, :, None] * Wgate.T[None, :, :]
         * dact_f[:, None, :]).reshape(B * dim, dim)
  h_rows = jnp.repeat(h_fin, dim, axis=0)           # row (b, j) -> h_final[b]

  rows3 = B * dim
  RK3, r3_pad = _pick_row_block(rows3, cap=512)
  if r3_pad:
    cg2 = jnp.pad(cg2, ((0, r3_pad), (0, 0)))
    h_rows = jnp.pad(h_rows, ((0, r3_pad), (0, 0)))
  rows3_full = rows3 + r3_pad

  k3_vmem = 4 * (4 * RK3 * dim + 2 * RK3 * dd + 2 * 2 * dim * dd)
  dwh2 = pl.pallas_call(
      _dwh_kernel,
      out_shape=jax.ShapeDtypeStruct((rows3_full, dd), jnp.float32),
      grid=(rows3_full // RK3,),
      in_specs=[
          pl.BlockSpec((RK3, dim), lambda r: (r, 0)),
          pl.BlockSpec((RK3, dim), lambda r: (r, 0)),
          pl.BlockSpec((dim, dd), lambda r: (0, 0)),
          pl.BlockSpec((dim, dd), lambda r: (0, 0)),
      ],
      out_specs=pl.BlockSpec((RK3, dd), lambda r: (r, 0)),
      compiler_params=pltpu.CompilerParams(
          dimension_semantics=("parallel",),
          vmem_limit_bytes=_vmem_limit(k3_vmem)),
  )(h_rows, cg2, SELP, SELQ)
  if r3_pad:
    dwh2 = dwh2[:rows3]
  dh_dWh = dwh2.reshape(B, dim, dim, dim)

  y = jnp.transpose(packed_tm[:T, :, :dim], (1, 0, 2))   # (B, T, dim)
  return h_fin, y, grad_hat, hidden_grads, dh_dWh


# ---------------------------------------------------------------------------
# Pure-JAX reference (mirrors the PyTorch code with torch.func.jacrev/vmap).
# ---------------------------------------------------------------------------
def _partial_forward_ref(Wx, Wgate, x, h, Wh):
  new_h = jax.nn.gelu(x @ Wx + h @ Wh, approximate=False)
  gate = jax.nn.sigmoid(new_h @ Wgate)
  h = gate * h + (1.0 - gate)
  return h, h


def syn_grad_block_forward_ref(x, Wx, Wh, Wgate, Wsynth, bsynth):
  B, T, _ = x.shape
  dim = Wh.shape[0]
  h = jnp.zeros((B, dim), jnp.float32)
  per_ex = lambda xi, hi, Whi: _partial_forward_ref(Wx, Wgate, xi, hi, Whi)
  jac_fn = jax.vmap(jax.jacrev(per_ex, argnums=1, has_aux=True))
  ys, jacs = [], []
  for i in range(T):
    Wh_b = jnp.broadcast_to(Wh, (B,) + Wh.shape)
    dh_dh, h = jac_fn(x[:, i, :], h, Wh_b)
    jacs.append(dh_dh)
    ys.append(h)
  dh_dwh = jax.jacrev(
      lambda W: _partial_forward_ref(Wx, Wgate, x[:, -1, :], h, W)[0])(Wh)
  grad_hat = h @ Wsynth.T + bsynth
  return h, jnp.stack(ys, axis=1), grad_hat, jnp.stack(jacs, axis=0), dh_dwh


if __name__ == "__main__":
  # SynGradBlock(dim): rnn = GateRNN(dim, dim)  ->  in_dim == dim.
  B, T, DIM = 2, 8, 32
  key = jax.random.PRNGKey(0)
  kx, kwx, kwg, kwh, kws, kbs = jax.random.split(key, 6)
  x = jax.random.normal(kx, (B, T, DIM), dtype=jnp.float32)
  Wx = 0.01 * jax.random.normal(kwx, (DIM, DIM), dtype=jnp.float32)
  Wgate = 0.01 * jax.random.normal(kwg, (DIM, DIM), dtype=jnp.float32)
  Wh = 0.01 * jax.random.normal(kwh, (DIM, DIM), dtype=jnp.float32)
  Wsynth = 0.1 * jax.random.normal(kws, (DIM, DIM), dtype=jnp.float32)
  bsynth = 0.1 * jax.random.normal(kbs, (DIM,), dtype=jnp.float32)

  outs = syn_grad_block_forward(x, Wx, Wh, Wgate, Wsynth, bsynth)
  jax.block_until_ready(outs)
  h, y, grad_hat, hidden_grads, dh_dWh = outs

  h_r, y_r, gh_r, jac_r, dwh_r = syn_grad_block_forward_ref(
      x, Wx, Wh, Wgate, Wsynth, bsynth)
  np.testing.assert_allclose(np.asarray(h), np.asarray(h_r),
                             rtol=1.5e-3, atol=2e-4)
  np.testing.assert_allclose(np.asarray(y), np.asarray(y_r),
                             rtol=1.5e-3, atol=2e-4)
  np.testing.assert_allclose(np.asarray(grad_hat), np.asarray(gh_r),
                             rtol=1.5e-3, atol=2e-4)
  np.testing.assert_allclose(np.asarray(hidden_grads), np.asarray(jac_r),
                             rtol=1.5e-3, atol=2e-4)
  np.testing.assert_allclose(np.asarray(dh_dWh), np.asarray(dwh_r),
                             rtol=1.5e-3, atol=2e-4)
  print("KERNEL_OK")
</pallas_src>

<mosaic_0001>
module attributes {stable_mosaic.version = 11 : i64} {
  func.func @_recurrence_kernel(%arg0: i32, %arg1: memref<8x2x32xf32, #tpu.memory_space<vmem>>, %arg2: memref<2x32xf32, #tpu.memory_space<vmem>>, %arg3: memref<32x32xf32, #tpu.memory_space<vmem>>, %arg4: memref<32x32xf32, #tpu.memory_space<vmem>>, %arg5: memref<32x32xf32, #tpu.memory_space<vmem>>, %arg6: memref<1x32xf32, #tpu.memory_space<vmem>>, %arg7: memref<2x32xf32, #tpu.memory_space<vmem>>, %arg8: memref<2x32xf32, #tpu.memory_space<vmem>>, %arg9: memref<2x32xf32, #tpu.memory_space<vmem>>, %arg10: memref<2x32xf32, #tpu.memory_space<vmem>>, %arg11: memref<8x2x128xf32, #tpu.memory_space<vmem>>, %arg12: memref<2x32xf32, #tpu.memory_space<vmem>>) attributes {dimension_semantics = [#tpu.dimension_semantics<arbitrary>], iteration_bounds = array<i64: 1>, scalar_prefetch = 0 : i64, scratch_operands = 1 : i64, tpu.core_type = #tpu.core_type<tc>, window_params = [{transform_indices = @transform_0, window_bounds = array<i64: 8, 2, 32>}, {pipeline_mode = #tpu.pipeline_mode<synchronous>, transform_indices = @transform_1, window_bounds = array<i64: 2, 32>}, {pipeline_mode = #tpu.pipeline_mode<synchronous>, transform_indices = @transform_2, window_bounds = array<i64: 32, 32>}, {pipeline_mode = #tpu.pipeline_mode<synchronous>, transform_indices = @transform_3, window_bounds = array<i64: 32, 32>}, {pipeline_mode = #tpu.pipeline_mode<synchronous>, transform_indices = @transform_4, window_bounds = array<i64: 32, 32>}, {pipeline_mode = #tpu.pipeline_mode<synchronous>, transform_indices = @transform_5, window_bounds = array<i64: 1, 32>}, {pipeline_mode = #tpu.pipeline_mode<synchronous>, transform_indices = @transform_6, window_bounds = array<i64: 2, 32>}, {pipeline_mode = #tpu.pipeline_mode<synchronous>, transform_indices = @transform_7, window_bounds = array<i64: 2, 32>}, {pipeline_mode = #tpu.pipeline_mode<synchronous>, transform_indices = @transform_8, window_bounds = array<i64: 2, 32>}, {pipeline_mode = #tpu.pipeline_mode<synchronous>, transform_indices = @transform_9, window_bounds = array<i64: 2, 32>}, {transform_indices = @transform_10, window_bounds = array<i64: 8, 2, 128>}]} {
    %c0_i32 = arith.constant 0 : i32
    %0 = arith.cmpi eq, %arg0, %c0_i32 : i32
    %1 = arith.extui %0 : i1 to i32
    %c0_i32_0 = arith.constant 0 : i32
    %2 = arith.cmpi ne, %1, %c0_i32_0 : i32
    scf.if %2 {
      %c0_258 = arith.constant 0 : index
      %c0_259 = arith.constant 0 : index
      %682 = vector.load %arg2[%c0_258, %c0_259] : memref<2x32xf32, #tpu.memory_space<vmem>>, vector<2x32xf32>
      %c0_260 = arith.constant 0 : index
      %c0_261 = arith.constant 0 : index
      %683 = vector.load %arg12[%c0_260, %c0_261] : memref<2x32xf32, #tpu.memory_space<vmem>>, vector<2x32xf32>
      tpu.vector_store %arg12[%c0_260, %c0_261], %682 {strides = array<i32>} : memref<2x32xf32, #tpu.memory_space<vmem>>, vector<2x32xf32>,
    } else {
    }
    %c0 = arith.constant 0 : index
    %c0_1 = arith.constant 0 : index
    %3 = vector.load %arg3[%c0, %c0_1] : memref<32x32xf32, #tpu.memory_space<vmem>>, vector<32x32xf32>
    %c0_2 = arith.constant 0 : index
    %c0_3 = arith.constant 0 : index
    %4 = vector.load %arg4[%c0_2, %c0_3] : memref<32x32xf32, #tpu.memory_space<vmem>>, vector<32x32xf32>
    %c0_4 = arith.constant 0 : index
    %c0_5 = arith.constant 0 : index
    %5 = vector.load %arg12[%c0_4, %c0_5] : memref<2x32xf32, #tpu.memory_space<vmem>>, vector<2x32xf32>
    %c0_i32_6 = arith.constant 0 : i32
    %6 = arith.index_cast %c0_i32_6 : i32 to index
    %c0_7 = arith.constant 0 : index
    %c0_8 = arith.constant 0 : index
    %7 = vector.load %arg1[%6, %c0_7, %c0_8] : memref<8x2x32xf32, #tpu.memory_space<vmem>>, vector<1x2x32xf32>
    %8 = vector.shape_cast %7 : vector<1x2x32xf32> to vector<2x32xf32>
    %cst = arith.constant dense<0.000000e+00> : vector<2x32xf32>
    %9 = tpu.matmul %5, %3, %cst {dimension_numbers = #tpu.dot_dimension_numbers<[1], [0], [0], [1], [0, 0, 1, 1], [], []>} : vector<2x32xf32>, vector<32x32xf32>, vector<2x32xf32> -> vector<2x32xf32>
    %10 = arith.addf %8, %9 : vector<2x32xf32>
    %cst_9 = arith.constant 0.707106769 : f32
    %11 = vector.broadcast %cst_9 : f32 to vector<2x32xf32>
    %12 = arith.mulf %10, %11 : vector<2x32xf32>
    %cst_10 = arith.constant -4.000000e+00 : f32
    %cst_11 = arith.constant 4.000000e+00 : f32
    %13 = vector.broadcast %cst_10 : f32 to vector<2x32xf32>
    %14 = arith.maximumf %13, %12 : vector<2x32xf32>
    %15 = vector.broadcast %cst_11 : f32 to vector<2x32xf32>
    %16 = arith.minimumf %15, %14 : vector<2x32xf32>
    %17 = arith.mulf %16, %16 : vector<2x32xf32>
    %18 = arith.mulf %17, %17 : vector<2x32xf32>
    %19 = arith.mulf %18, %18 : vector<2x32xf32>
    %cst_12 = arith.constant -0.00295460061 : f32
    %20 = vector.broadcast %cst_12 : f32 to vector<2x32xf32>
    %21 = arith.mulf %20, %17 : vector<2x32xf32>
    %cst_13 = arith.constant -0.0160960332 : f32
    %22 = vector.broadcast %cst_13 : f32 to vector<2x32xf32>
    %23 = arith.addf %22, %21 : vector<2x32xf32>
    %cst_14 = arith.constant -5.69250624E-5 : f32
    %24 = vector.broadcast %cst_14 : f32 to vector<2x32xf32>
    %25 = arith.mulf %24, %17 : vector<2x32xf32>
    %cst_15 = arith.constant -7.34990637E-4 : f32
    %26 = vector.broadcast %cst_15 : f32 to vector<2x32xf32>
    %27 = arith.addf %26, %25 : vector<2x32xf32>
    %28 = arith.mulf %27, %18 : vector<2x32xf32>
    %29 = arith.addf %23, %28 : vector<2x32xf32>
    %cst_16 = arith.constant 2.77068146E-8 : f32
    %30 = vector.broadcast %cst_16 : f32 to vector<2x32xf32>
    %31 = arith.mulf %30, %17 : vector<2x32xf32>
    %cst_17 = arith.constant -2.10102394E-6 : f32
    %32 = vector.broadcast %cst_17 : f32 to vector<2x32xf32>
    %33 = arith.addf %32, %31 : vector<2x32xf32>
    %cst_18 = arith.constant -2.72614237E-10 : f32
    %34 = vector.broadcast %cst_18 : f32 to vector<2x32xf32>
    %35 = arith.mulf %34, %18 : vector<2x32xf32>
    %36 = arith.addf %33, %35 : vector<2x32xf32>
    %37 = arith.mulf %36, %19 : vector<2x32xf32>
    %38 = arith.addf %29, %37 : vector<2x32xf32>
    %cst_19 = arith.constant -0.00737332925 : f32
    %39 = vector.broadcast %cst_19 : f32 to vector<2x32xf32>
    %40 = arith.mulf %39, %17 : vector<2x32xf32>
    %cst_20 = arith.constant -0.0142647391 : f32
    %41 = vector.broadcast %cst_20 : f32 to vector<2x32xf32>
    %42 = arith.addf %41, %40 : vector<2x32xf32>
    %cst_21 = arith.constant -2.13374049E-4 : f32
    %43 = vector.broadcast %cst_21 : f32 to vector<2x32xf32>
    %44 = arith.mulf %43, %17 : vector<2x32xf32>
    %cst_22 = arith.constant -0.00168282702 : f32
    %45 = vector.broadcast %cst_22 : f32 to vector<2x32xf32>
    %46 = arith.addf %45, %44 : vector<2x32xf32>
    %cst_23 = arith.constant -1.45660715E-5 : f32
    %47 = vector.broadcast %cst_23 : f32 to vector<2x32xf32>
    %48 = arith.mulf %47, %18 : vector<2x32xf32>
    %49 = arith.addf %46, %48 : vector<2x32xf32>
    %50 = arith.mulf %49, %18 : vector<2x32xf32>
    %51 = arith.addf %42, %50 : vector<2x32xf32>
    %52 = arith.mulf %38, %16 : vector<2x32xf32>
    %53 = arith.divf %52, %51 : vector<2x32xf32>
    %cst_24 = arith.constant 1.000000e+00 : f32
    %54 = vector.broadcast %cst_24 : f32 to vector<2x32xf32>
    %55 = arith.addf %54, %53 : vector<2x32xf32>
    %cst_25 = arith.constant 5.000000e-01 : f32
    %56 = vector.broadcast %cst_25 : f32 to vector<2x32xf32>
    %57 = arith.mulf %56, %55 : vector<2x32xf32>
    %cst_26 = arith.constant -5.000000e-01 : f32
    %58 = vector.broadcast %cst_26 : f32 to vector<2x32xf32>
    %59 = arith.mulf %58, %10 : vector<2x32xf32>
    %60 = arith.mulf %59, %10 : vector<2x32xf32>
    %61 = math.exp %60 : vector<2x32xf32>
    %cst_27 = arith.constant 0.398942292 : f32
    %62 = vector.broadcast %cst_27 : f32 to vector<2x32xf32>
    %63 = arith.mulf %61, %62 : vector<2x32xf32>
    %64 = arith.mulf %10, %57 : vector<2x32xf32>
    %65 = arith.mulf %10, %63 : vector<2x32xf32>
    %66 = arith.addf %57, %65 : vector<2x32xf32>
    %cst_28 = arith.constant dense<0.000000e+00> : vector<2x32xf32>
    %67 = tpu.matmul %64, %4, %cst_28 {dimension_numbers = #tpu.dot_dimension_numbers<[1], [0], [0], [1], [0, 0, 1, 1], [], []>} : vector<2x32xf32>, vector<32x32xf32>, vector<2x32xf32> -> vector<2x32xf32>
    %cst_29 = arith.constant 0.000000e+00 : f32
    %68 = vector.broadcast %cst_29 : f32 to vector<2x32xf32>
    %69 = arith.subf %68, %67 : vector<2x32xf32>
    %70 = math.exp %69 : vector<2x32xf32>
    %cst_30 = arith.constant 1.000000e+00 : f32
    %71 = vector.broadcast %cst_30 : f32 to vector<2x32xf32>
    %72 = arith.addf %71, %70 : vector<2x32xf32>
    %cst_31 = arith.constant 1.000000e+00 : f32
    %73 = vector.broadcast %cst_31 : f32 to vector<2x32xf32>
    %74 = arith.divf %73, %72 : vector<2x32xf32>
    %75 = arith.mulf %74, %5 : vector<2x32xf32>
    %cst_32 = arith.constant 1.000000e+00 : f32
    %76 = vector.broadcast %cst_32 : f32 to vector<2x32xf32>
    %77 = arith.subf %76, %74 : vector<2x32xf32>
    %78 = arith.addf %75, %77 : vector<2x32xf32>
    %cst_33 = arith.constant 1.000000e+00 : f32
    %79 = vector.broadcast %cst_33 : f32 to vector<2x32xf32>
    %80 = arith.subf %5, %79 : vector<2x32xf32>
    %81 = arith.mulf %80, %74 : vector<2x32xf32>
    %cst_34 = arith.constant 1.000000e+00 : f32
    %82 = vector.broadcast %cst_34 : f32 to vector<2x32xf32>
    %83 = arith.subf %82, %74 : vector<2x32xf32>
    %84 = arith.mulf %81, %83 : vector<2x32xf32>
    %85 = tpu.concatenate %78, %66, %74, %84 in 1 : vector<2x32xf32>, vector<2x32xf32>, vector<2x32xf32>, vector<2x32xf32> -> vector<2x128xf32>
    %86 = arith.index_cast %c0_i32_6 : i32 to index
    %c0_35 = arith.constant 0 : index
    %c0_36 = arith.constant 0 : index
    %87 = vector.load %arg11[%86, %c0_35, %c0_36] : memref<8x2x128xf32, #tpu.memory_space<vmem>>, vector<1x2x128xf32>
    %88 = vector.shape_cast %87 : vector<1x2x128xf32> to vector<2x128xf32>
    %89 = vector.shape_cast %85 : vector<2x128xf32> to vector<1x2x128xf32>
    tpu.vector_store %arg11[%86, %c0_35, %c0_36], %89 {strides = array<i32>} : memref<8x2x128xf32, #tpu.memory_space<vmem>>, vector<1x2x128xf32>,
    %c1_i32 = arith.constant 1 : i32
    %90 = arith.index_cast %c1_i32 : i32 to index
    %c0_37 = arith.constant 0 : index
    %c0_38 = arith.constant 0 : index
    %91 = vector.load %arg1[%90, %c0_37, %c0_38] : memref<8x2x32xf32, #tpu.memory_space<vmem>>, vector<1x2x32xf32>
    %92 = vector.shape_cast %91 : vector<1x2x32xf32> to vector<2x32xf32>
    %cst_39 = arith.constant dense<0.000000e+00> : vector<2x32xf32>
    %93 = tpu.matmul %78, %3, %cst_39 {dimension_numbers = #tpu.dot_dimension_numbers<[1], [0], [0], [1], [0, 0, 1, 1], [], []>} : vector<2x32xf32>, vector<32x32xf32>, vector<2x32xf32> -> vector<2x32xf32>
    %94 = arith.addf %92, %93 : vector<2x32xf32>
    %cst_40 = arith.constant 0.707106769 : f32
    %95 = vector.broadcast %cst_40 : f32 to vector<2x32xf32>
    %96 = arith.mulf %94, %95 : vector<2x32xf32>
    %cst_41 = arith.constant -4.000000e+00 : f32
    %cst_42 = arith.constant 4.000000e+00 : f32
    %97 = vector.broadcast %cst_41 : f32 to vector<2x32xf32>
    %98 = arith.maximumf %97, %96 : vector<2x32xf32>
    %99 = vector.broadcast %cst_42 : f32 to vector<2x32xf32>
    %100 = arith.minimumf %99, %98 : vector<2x32xf32>
    %101 = arith.mulf %100, %100 : vector<2x32xf32>
    %102 = arith.mulf %101, %101 : vector<2x32xf32>
    %103 = arith.mulf %102, %102 : vector<2x32xf32>
    %cst_43 = arith.constant -0.00295460061 : f32
    %104 = vector.broadcast %cst_43 : f32 to vector<2x32xf32>
    %105 = arith.mulf %104, %101 : vector<2x32xf32>
    %cst_44 = arith.constant -0.0160960332 : f32
    %106 = vector.broadcast %cst_44 : f32 to vector<2x32xf32>
    %107 = arith.addf %106, %105 : vector<2x32xf32>
    %cst_45 = arith.constant -5.69250624E-5 : f32
    %108 = vector.broadcast %cst_45 : f32 to vector<2x32xf32>
    %109 = arith.mulf %108, %101 : vector<2x32xf32>
    %cst_46 = arith.constant -7.34990637E-4 : f32
    %110 = vector.broadcast %cst_46 : f32 to vector<2x32xf32>
    %111 = arith.addf %110, %109 : vector<2x32xf32>
    %112 = arith.mulf %111, %102 : vector<2x32xf32>
    %113 = arith.addf %107, %112 : vector<2x32xf32>
    %cst_47 = arith.constant 2.77068146E-8 : f32
    %114 = vector.broadcast %cst_47 : f32 to vector<2x32xf32>
    %115 = arith.mulf %114, %101 : vector<2x32xf32>
    %cst_48 = arith.constant -2.10102394E-6 : f32
    %116 = vector.broadcast %cst_48 : f32 to vector<2x32xf32>
    %117 = arith.addf %116, %115 : vector<2x32xf32>
    %cst_49 = arith.constant -2.72614237E-10 : f32
    %118 = vector.broadcast %cst_49 : f32 to vector<2x32xf32>
    %119 = arith.mulf %118, %102 : vector<2x32xf32>
    %120 = arith.addf %117, %119 : vector<2x32xf32>
    %121 = arith.mulf %120, %103 : vector<2x32xf32>
    %122 = arith.addf %113, %121 : vector<2x32xf32>
    %cst_50 = arith.constant -0.00737332925 : f32
    %123 = vector.broadcast %cst_50 : f32 to vector<2x32xf32>
    %124 = arith.mulf %123, %101 : vector<2x32xf32>
    %cst_51 = arith.constant -0.0142647391 : f32
    %125 = vector.broadcast %cst_51 : f32 to vector<2x32xf32>
    %126 = arith.addf %125, %124 : vector<2x32xf32>
    %cst_52 = arith.constant -2.13374049E-4 : f32
    %127 = vector.broadcast %cst_52 : f32 to vector<2x32xf32>
    %128 = arith.mulf %127, %101 : vector<2x32xf32>
    %cst_53 = arith.constant -0.00168282702 : f32
    %129 = vector.broadcast %cst_53 : f32 to vector<2x32xf32>
    %130 = arith.addf %129, %128 : vector<2x32xf32>
    %cst_54 = arith.constant -1.45660715E-5 : f32
    %131 = vector.broadcast %cst_54 : f32 to vector<2x32xf32>
    %132 = arith.mulf %131, %102 : vector<2x32xf32>
    %133 = arith.addf %130, %132 : vector<2x32xf32>
    %134 = arith.mulf %133, %102 : vector<2x32xf32>
    %135 = arith.addf %126, %134 : vector<2x32xf32>
    %136 = arith.mulf %122, %100 : vector<2x32xf32>
    %137 = arith.divf %136, %135 : vector<2x32xf32>
    %cst_55 = arith.constant 1.000000e+00 : f32
    %138 = vector.broadcast %cst_55 : f32 to vector<2x32xf32>
    %139 = arith.addf %138, %137 : vector<2x32xf32>
    %cst_56 = arith.constant 5.000000e-01 : f32
    %140 = vector.broadcast %cst_56 : f32 to vector<2x32xf32>
    %141 = arith.mulf %140, %139 : vector<2x32xf32>
    %cst_57 = arith.constant -5.000000e-01 : f32
    %142 = vector.broadcast %cst_57 : f32 to vector<2x32xf32>
    %143 = arith.mulf %142, %94 : vector<2x32xf32>
    %144 = arith.mulf %143, %94 : vector<2x32xf32>
    %145 = math.exp %144 : vector<2x32xf32>
    %cst_58 = arith.constant 0.398942292 : f32
    %146 = vector.broadcast %cst_58 : f32 to vector<2x32xf32>
    %147 = arith.mulf %145, %146 : vector<2x32xf32>
    %148 = arith.mulf %94, %141 : vector<2x32xf32>
    %149 = arith.mulf %94, %147 : vector<2x32xf32>
    %150 = arith.addf %141, %149 : vector<2x32xf32>
    %cst_59 = arith.constant dense<0.000000e+00> : vector<2x32xf32>
    %151 = tpu.matmul %148, %4, %cst_59 {dimension_numbers = #tpu.dot_dimension_numbers<[1], [0], [0], [1], [0, 0, 1, 1], [], []>} : vector<2x32xf32>, vector<32x32xf32>, vector<2x32xf32> -> vector<2x32xf32>
    %cst_60 = arith.constant 0.000000e+00 : f32
    %152 = vector.broadcast %cst_60 : f32 to vector<2x32xf32>
    %153 = arith.subf %152, %151 : vector<2x32xf32>
    %154 = math.exp %153 : vector<2x32xf32>
    %cst_61 = arith.constant 1.000000e+00 : f32
    %155 = vector.broadcast %cst_61 : f32 to vector<2x32xf32>
    %156 = arith.addf %155, %154 : vector<2x32xf32>
    %cst_62 = arith.constant 1.000000e+00 : f32
    %157 = vector.broadcast %cst_62 : f32 to vector<2x32xf32>
    %158 = arith.divf %157, %156 : vector<2x32xf32>
    %159 = arith.mulf %158, %78 : vector<2x32xf32>
    %cst_63 = arith.constant 1.000000e+00 : f32
    %160 = vector.broadcast %cst_63 : f32 to vector<2x32xf32>
    %161 = arith.subf %160, %158 : vector<2x32xf32>
    %162 = arith.addf %159, %161 : vector<2x32xf32>
    %cst_64 = arith.constant 1.000000e+00 : f32
    %163 = vector.broadcast %cst_64 : f32 to vector<2x32xf32>
    %164 = arith.subf %78, %163 : vector<2x32xf32>
    %165 = arith.mulf %164, %158 : vector<2x32xf32>
    %cst_65 = arith.constant 1.000000e+00 : f32
    %166 = vector.broadcast %cst_65 : f32 to vector<2x32xf32>
    %167 = arith.subf %166, %158 : vector<2x32xf32>
    %168 = arith.mulf %165, %167 : vector<2x32xf32>
    %169 = tpu.concatenate %162, %150, %158, %168 in 1 : vector<2x32xf32>, vector<2x32xf32>, vector<2x32xf32>, vector<2x32xf32> -> vector<2x128xf32>
    %170 = arith.index_cast %c1_i32 : i32 to index
    %c0_66 = arith.constant 0 : index
    %c0_67 = arith.constant 0 : index
    %171 = vector.load %arg11[%170, %c0_66, %c0_67] : memref<8x2x128xf32, #tpu.memory_space<vmem>>, vector<1x2x128xf32>
    %172 = vector.shape_cast %171 : vector<1x2x128xf32> to vector<2x128xf32>
    %173 = vector.shape_cast %169 : vector<2x128xf32> to vector<1x2x128xf32>
    tpu.vector_store %arg11[%170, %c0_66, %c0_67], %173 {strides = array<i32>} : memref<8x2x128xf32, #tpu.memory_space<vmem>>, vector<1x2x128xf32>,
    %c2_i32 = arith.constant 2 : i32
    %174 = arith.index_cast %c2_i32 : i32 to index
    %c0_68 = arith.constant 0 : index
    %c0_69 = arith.constant 0 : index
    %175 = vector.load %arg1[%174, %c0_68, %c0_69] : memref<8x2x32xf32, #tpu.memory_space<vmem>>, vector<1x2x32xf32>
    %176 = vector.shape_cast %175 : vector<1x2x32xf32> to vector<2x32xf32>
    %cst_70 = arith.constant dense<0.000000e+00> : vector<2x32xf32>
    %177 = tpu.matmul %162, %3, %cst_70 {dimension_numbers = #tpu.dot_dimension_numbers<[1], [0], [0], [1], [0, 0, 1, 1], [], []>} : vector<2x32xf32>, vector<32x32xf32>, vector<2x32xf32> -> vector<2x32xf32>
    %178 = arith.addf %176, %177 : vector<2x32xf32>
    %cst_71 = arith.constant 0.707106769 : f32
    %179 = vector.broadcast %cst_71 : f32 to vector<2x32xf32>
    %180 = arith.mulf %178, %179 : vector<2x32xf32>
    %cst_72 = arith.constant -4.000000e+00 : f32
    %cst_73 = arith.constant 4.000000e+00 : f32
    %181 = vector.broadcast %cst_72 : f32 to vector<2x32xf32>
    %182 = arith.maximumf %181, %180 : vector<2x32xf32>
    %183 = vector.broadcast %cst_73 : f32 to vector<2x32xf32>
    %184 = arith.minimumf %183, %182 : vector<2x32xf32>
    %185 = arith.mulf %184, %184 : vector<2x32xf32>
    %186 = arith.mulf %185, %185 : vector<2x32xf32>
    %187 = arith.mulf %186, %186 : vector<2x32xf32>
    %cst_74 = arith.constant -0.00295460061 : f32
    %188 = vector.broadcast %cst_74 : f32 to vector<2x32xf32>
    %189 = arith.mulf %188, %185 : vector<2x32xf32>
    %cst_75 = arith.constant -0.0160960332 : f32
    %190 = vector.broadcast %cst_75 : f32 to vector<2x32xf32>
    %191 = arith.addf %190, %189 : vector<2x32xf32>
    %cst_76 = arith.constant -5.69250624E-5 : f32
    %192 = vector.broadcast %cst_76 : f32 to vector<2x32xf32>
    %193 = arith.mulf %192, %185 : vector<2x32xf32>
    %cst_77 = arith.constant -7.34990637E-4 : f32
    %194 = vector.broadcast %cst_77 : f32 to vector<2x32xf32>
    %195 = arith.addf %194, %193 : vector<2x32xf32>
    %196 = arith.mulf %195, %186 : vector<2x32xf32>
    %197 = arith.addf %191, %196 : vector<2x32xf32>
    %cst_78 = arith.constant 2.77068146E-8 : f32
    %198 = vector.broadcast %cst_78 : f32 to vector<2x32xf32>
    %199 = arith.mulf %198, %185 : vector<2x32xf32>
    %cst_79 = arith.constant -2.10102394E-6 : f32
    %200 = vector.broadcast %cst_79 : f32 to vector<2x32xf32>
    %201 = arith.addf %200, %199 : vector<2x32xf32>
    %cst_80 = arith.constant -2.72614237E-10 : f32
    %202 = vector.broadcast %cst_80 : f32 to vector<2x32xf32>
    %203 = arith.mulf %202, %186 : vector<2x32xf32>
    %204 = arith.addf %201, %203 : vector<2x32xf32>
    %205 = arith.mulf %204, %187 : vector<2x32xf32>
    %206 = arith.addf %197, %205 : vector<2x32xf32>
    %cst_81 = arith.constant -0.00737332925 : f32
    %207 = vector.broadcast %cst_81 : f32 to vector<2x32xf32>
    %208 = arith.mulf %207, %185 : vector<2x32xf32>
    %cst_82 = arith.constant -0.0142647391 : f32
    %209 = vector.broadcast %cst_82 : f32 to vector<2x32xf32>
    %210 = arith.addf %209, %208 : vector<2x32xf32>
    %cst_83 = arith.constant -2.13374049E-4 : f32
    %211 = vector.broadcast %cst_83 : f32 to vector<2x32xf32>
    %212 = arith.mulf %211, %185 : vector<2x32xf32>
    %cst_84 = arith.constant -0.00168282702 : f32
    %213 = vector.broadcast %cst_84 : f32 to vector<2x32xf32>
    %214 = arith.addf %213, %212 : vector<2x32xf32>
    %cst_85 = arith.constant -1.45660715E-5 : f32
    %215 = vector.broadcast %cst_85 : f32 to vector<2x32xf32>
    %216 = arith.mulf %215, %186 : vector<2x32xf32>
    %217 = arith.addf %214, %216 : vector<2x32xf32>
    %218 = arith.mulf %217, %186 : vector<2x32xf32>
    %219 = arith.addf %210, %218 : vector<2x32xf32>
    %220 = arith.mulf %206, %184 : vector<2x32xf32>
    %221 = arith.divf %220, %219 : vector<2x32xf32>
    %cst_86 = arith.constant 1.000000e+00 : f32
    %222 = vector.broadcast %cst_86 : f32 to vector<2x32xf32>
    %223 = arith.addf %222, %221 : vector<2x32xf32>
    %cst_87 = arith.constant 5.000000e-01 : f32
    %224 = vector.broadcast %cst_87 : f32 to vector<2x32xf32>
    %225 = arith.mulf %224, %223 : vector<2x32xf32>
    %cst_88 = arith.constant -5.000000e-01 : f32
    %226 = vector.broadcast %cst_88 : f32 to vector<2x32xf32>
    %227 = arith.mulf %226, %178 : vector<2x32xf32>
    %228 = arith.mulf %227, %178 : vector<2x32xf32>
    %229 = math.exp %228 : vector<2x32xf32>
    %cst_89 = arith.constant 0.398942292 : f32
    %230 = vector.broadcast %cst_89 : f32 to vector<2x32xf32>
    %231 = arith.mulf %229, %230 : vector<2x32xf32>
    %232 = arith.mulf %178, %225 : vector<2x32xf32>
    %233 = arith.mulf %178, %231 : vector<2x32xf32>
    %234 = arith.addf %225, %233 : vector<2x32xf32>
    %cst_90 = arith.constant dense<0.000000e+00> : vector<2x32xf32>
    %235 = tpu.matmul %232, %4, %cst_90 {dimension_numbers = #tpu.dot_dimension_numbers<[1], [0], [0], [1], [0, 0, 1, 1], [], []>} : vector<2x32xf32>, vector<32x32xf32>, vector<2x32xf32> -> vector<2x32xf32>
    %cst_91 = arith.constant 0.000000e+00 : f32
    %236 = vector.broadcast %cst_91 : f32 to vector<2x32xf32>
    %237 = arith.subf %236, %235 : vector<2x32xf32>
    %238 = math.exp %237 : vector<2x32xf32>
    %cst_92 = arith.constant 1.000000e+00 : f32
    %239 = vector.broadcast %cst_92 : f32 to vector<2x32xf32>
    %240 = arith.addf %239, %238 : vector<2x32xf32>
    %cst_93 = arith.constant 1.000000e+00 : f32
    %241 = vector.broadcast %cst_93 : f32 to vector<2x32xf32>
    %242 = arith.divf %241, %240 : vector<2x32xf32>
    %243 = arith.mulf %242, %162 : vector<2x32xf32>
    %cst_94 = arith.constant 1.000000e+00 : f32
    %244 = vector.broadcast %cst_94 : f32 to vector<2x32xf32>
    %245 = arith.subf %244, %242 : vector<2x32xf32>
    %246 = arith.addf %243, %245 : vector<2x32xf32>
    %cst_95 = arith.constant 1.000000e+00 : f32
    %247 = vector.broadcast %cst_95 : f32 to vector<2x32xf32>
    %248 = arith.subf %162, %247 : vector<2x32xf32>
    %249 = arith.mulf %248, %242 : vector<2x32xf32>
    %cst_96 = arith.constant 1.000000e+00 : f32
    %250 = vector.broadcast %cst_96 : f32 to vector<2x32xf32>
    %251 = arith.subf %250, %242 : vector<2x32xf32>
    %252 = arith.mulf %249, %251 : vector<2x32xf32>
    %253 = tpu.concatenate %246, %234, %242, %252 in 1 : vector<2x32xf32>, vector<2x32xf32>, vector<2x32xf32>, vector<2x32xf32> -> vector<2x128xf32>
    %254 = arith.index_cast %c2_i32 : i32 to index
    %c0_97 = arith.constant 0 : index
    %c0_98 = arith.constant 0 : index
    %255 = vector.load %arg11[%254, %c0_97, %c0_98] : memref<8x2x128xf32, #tpu.memory_space<vmem>>, vector<1x2x128xf32>
    %256 = vector.shape_cast %255 : vector<1x2x128xf32> to vector<2x128xf32>
    %257 = vector.shape_cast %253 : vector<2x128xf32> to vector<1x2x128xf32>
    tpu.vector_store %arg11[%254, %c0_97, %c0_98], %257 {strides = array<i32>} : memref<8x2x128xf32, #tpu.memory_space<vmem>>, vector<1x2x128xf32>,
    %c3_i32 = arith.constant 3 : i32
    %258 = arith.index_cast %c3_i32 : i32 to index
    %c0_99 = arith.constant 0 : index
    %c0_100 = arith.constant 0 : index
    %259 = vector.load %arg1[%258, %c0_99, %c0_100] : memref<8x2x32xf32, #tpu.memory_space<vmem>>, vector<1x2x32xf32>
    %260 = vector.shape_cast %259 : vector<1x2x32xf32> to vector<2x32xf32>
    %cst_101 = arith.constant dense<0.000000e+00> : vector<2x32xf32>
    %261 = tpu.matmul %246, %3, %cst_101 {dimension_numbers = #tpu.dot_dimension_numbers<[1], [0], [0], [1], [0, 0, 1, 1], [], []>} : vector<2x32xf32>, vector<32x32xf32>, vector<2x32xf32> -> vector<2x32xf32>
    %262 = arith.addf %260, %261 : vector<2x32xf32>
    %cst_102 = arith.constant 0.707106769 : f32
    %263 = vector.broadcast %cst_102 : f32 to vector<2x32xf32>
    %264 = arith.mulf %262, %263 : vector<2x32xf32>
    %cst_103 = arith.constant -4.000000e+00 : f32
    %cst_104 = arith.constant 4.000000e+00 : f32
    %265 = vector.broadcast %cst_103 : f32 to vector<2x32xf32>
    %266 = arith.maximumf %265, %264 : vector<2x32xf32>
    %267 = vector.broadcast %cst_104 : f32 to vector<2x32xf32>
    %268 = arith.minimumf %267, %266 : vector<2x32xf32>
    %269 = arith.mulf %268, %268 : vector<2x32xf32>
    %270 = arith.mulf %269, %269 : vector<2x32xf32>
    %271 = arith.mulf %270, %270 : vector<2x32xf32>
    %cst_105 = arith.constant -0.00295460061 : f32
    %272 = vector.broadcast %cst_105 : f32 to vector<2x32xf32>
    %273 = arith.mulf %272, %269 : vector<2x32xf32>
    %cst_106 = arith.constant -0.0160960332 : f32
    %274 = vector.broadcast %cst_106 : f32 to vector<2x32xf32>
    %275 = arith.addf %274, %273 : vector<2x32xf32>
    %cst_107 = arith.constant -5.69250624E-5 : f32
    %276 = vector.broadcast %cst_107 : f32 to vector<2x32xf32>
    %277 = arith.mulf %276, %269 : vector<2x32xf32>
    %cst_108 = arith.constant -7.34990637E-4 : f32
    %278 = vector.broadcast %cst_108 : f32 to vector<2x32xf32>
    %279 = arith.addf %278, %277 : vector<2x32xf32>
    %280 = arith.mulf %279, %270 : vector<2x32xf32>
    %281 = arith.addf %275, %280 : vector<2x32xf32>
    %cst_109 = arith.constant 2.77068146E-8 : f32
    %282 = vector.broadcast %cst_109 : f32 to vector<2x32xf32>
    %283 = arith.mulf %282, %269 : vector<2x32xf32>
    %cst_110 = arith.constant -2.10102394E-6 : f32
    %284 = vector.broadcast %cst_110 : f32 to vector<2x32xf32>
    %285 = arith.addf %284, %283 : vector<2x32xf32>
    %cst_111 = arith.constant -2.72614237E-10 : f32
    %286 = vector.broadcast %cst_111 : f32 to vector<2x32xf32>
    %287 = arith.mulf %286, %270 : vector<2x32xf32>
    %288 = arith.addf %285, %287 : vector<2x32xf32>
    %289 = arith.mulf %288, %271 : vector<2x32xf32>
    %290 = arith.addf %281, %289 : vector<2x32xf32>
    %cst_112 = arith.constant -0.00737332925 : f32
    %291 = vector.broadcast %cst_112 : f32 to vector<2x32xf32>
    %292 = arith.mulf %291, %269 : vector<2x32xf32>
    %cst_113 = arith.constant -0.0142647391 : f32
    %293 = vector.broadcast %cst_113 : f32 to vector<2x32xf32>
    %294 = arith.addf %293, %292 : vector<2x32xf32>
    %cst_114 = arith.constant -2.13374049E-4 : f32
    %295 = vector.broadcast %cst_114 : f32 to vector<2x32xf32>
    %296 = arith.mulf %295, %269 : vector<2x32xf32>
    %cst_115 = arith.constant -0.00168282702 : f32
    %297 = vector.broadcast %cst_115 : f32 to vector<2x32xf32>
    %298 = arith.addf %297, %296 : vector<2x32xf32>
    %cst_116 = arith.constant -1.45660715E-5 : f32
    %299 = vector.broadcast %cst_116 : f32 to vector<2x32xf32>
    %300 = arith.mulf %299, %270 : vector<2x32xf32>
    %301 = arith.addf %298, %300 : vector<2x32xf32>
    %302 = arith.mulf %301, %270 : vector<2x32xf32>
    %303 = arith.addf %294, %302 : vector<2x32xf32>
    %304 = arith.mulf %290, %268 : vector<2x32xf32>
    %305 = arith.divf %304, %303 : vector<2x32xf32>
    %cst_117 = arith.constant 1.000000e+00 : f32
    %306 = vector.broadcast %cst_117 : f32 to vector<2x32xf32>
    %307 = arith.addf %306, %305 : vector<2x32xf32>
    %cst_118 = arith.constant 5.000000e-01 : f32
    %308 = vector.broadcast %cst_118 : f32 to vector<2x32xf32>
    %309 = arith.mulf %308, %307 : vector<2x32xf32>
    %cst_119 = arith.constant -5.000000e-01 : f32
    %310 = vector.broadcast %cst_119 : f32 to vector<2x32xf32>
    %311 = arith.mulf %310, %262 : vector<2x32xf32>
    %312 = arith.mulf %311, %262 : vector<2x32xf32>
    %313 = math.exp %312 : vector<2x32xf32>
    %cst_120 = arith.constant 0.398942292 : f32
    %314 = vector.broadcast %cst_120 : f32 to vector<2x32xf32>
    %315 = arith.mulf %313, %314 : vector<2x32xf32>
    %316 = arith.mulf %262, %309 : vector<2x32xf32>
    %317 = arith.mulf %262, %315 : vector<2x32xf32>
    %318 = arith.addf %309, %317 : vector<2x32xf32>
    %cst_121 = arith.constant dense<0.000000e+00> : vector<2x32xf32>
    %319 = tpu.matmul %316, %4, %cst_121 {dimension_numbers = #tpu.dot_dimension_numbers<[1], [0], [0], [1], [0, 0, 1, 1], [], []>} : vector<2x32xf32>, vector<32x32xf32>, vector<2x32xf32> -> vector<2x32xf32>
    %cst_122 = arith.constant 0.000000e+00 : f32
    %320 = vector.broadcast %cst_122 : f32 to vector<2x32xf32>
    %321 = arith.subf %320, %319 : vector<2x32xf32>
    %322 = math.exp %321 : vector<2x32xf32>
    %cst_123 = arith.constant 1.000000e+00 : f32
    %323 = vector.broadcast %cst_123 : f32 to vector<2x32xf32>
    %324 = arith.addf %323, %322 : vector<2x32xf32>
    %cst_124 = arith.constant 1.000000e+00 : f32
    %325 = vector.broadcast %cst_124 : f32 to vector<2x32xf32>
    %326 = arith.divf %325, %324 : vector<2x32xf32>
    %327 = arith.mulf %326, %246 : vector<2x32xf32>
    %cst_125 = arith.constant 1.000000e+00 : f32
    %328 = vector.broadcast %cst_125 : f32 to vector<2x32xf32>
    %329 = arith.subf %328, %326 : vector<2x32xf32>
    %330 = arith.addf %327, %329 : vector<2x32xf32>
    %cst_126 = arith.constant 1.000000e+00 : f32
    %331 = vector.broadcast %cst_126 : f32 to vector<2x32xf32>
    %332 = arith.subf %246, %331 : vector<2x32xf32>
    %333 = arith.mulf %332, %326 : vector<2x32xf32>
    %cst_127 = arith.constant 1.000000e+00 : f32
    %334 = vector.broadcast %cst_127 : f32 to vector<2x32xf32>
    %335 = arith.subf %334, %326 : vector<2x32xf32>
    %336 = arith.mulf %333, %335 : vector<2x32xf32>
    %337 = tpu.concatenate %330, %318, %326, %336 in 1 : vector<2x32xf32>, vector<2x32xf32>, vector<2x32xf32>, vector<2x32xf32> -> vector<2x128xf32>
    %338 = arith.index_cast %c3_i32 : i32 to index
    %c0_128 = arith.constant 0 : index
    %c0_129 = arith.constant 0 : index
    %339 = vector.load %arg11[%338, %c0_128, %c0_129] : memref<8x2x128xf32, #tpu.memory_space<vmem>>, vector<1x2x128xf32>
    %340 = vector.shape_cast %339 : vector<1x2x128xf32> to vector<2x128xf32>
    %341 = vector.shape_cast %337 : vector<2x128xf32> to vector<1x2x128xf32>
    tpu.vector_store %arg11[%338, %c0_128, %c0_129], %341 {strides = array<i32>} : memref<8x2x128xf32, #tpu.memory_space<vmem>>, vector<1x2x128xf32>,
    %c4_i32 = arith.constant 4 : i32
    %342 = arith.index_cast %c4_i32 : i32 to index
    %c0_130 = arith.constant 0 : index
    %c0_131 = arith.constant 0 : index
    %343 = vector.load %arg1[%342, %c0_130, %c0_131] : memref<8x2x32xf32, #tpu.memory_space<vmem>>, vector<1x2x32xf32>
    %344 = vector.shape_cast %343 : vector<1x2x32xf32> to vector<2x32xf32>
    %cst_132 = arith.constant dense<0.000000e+00> : vector<2x32xf32>
    %345 = tpu.matmul %330, %3, %cst_132 {dimension_numbers = #tpu.dot_dimension_numbers<[1], [0], [0], [1], [0, 0, 1, 1], [], []>} : vector<2x32xf32>, vector<32x32xf32>, vector<2x32xf32> -> vector<2x32xf32>
    %346 = arith.addf %344, %345 : vector<2x32xf32>
    %cst_133 = arith.constant 0.707106769 : f32
    %347 = vector.broadcast %cst_133 : f32 to vector<2x32xf32>
    %348 = arith.mulf %346, %347 : vector<2x32xf32>
    %cst_134 = arith.constant -4.000000e+00 : f32
    %cst_135 = arith.constant 4.000000e+00 : f32
    %349 = vector.broadcast %cst_134 : f32 to vector<2x32xf32>
    %350 = arith.maximumf %349, %348 : vector<2x32xf32>
    %351 = vector.broadcast %cst_135 : f32 to vector<2x32xf32>
    %352 = arith.minimumf %351, %350 : vector<2x32xf32>
    %353 = arith.mulf %352, %352 : vector<2x32xf32>
    %354 = arith.mulf %353, %353 : vector<2x32xf32>
    %355 = arith.mulf %354, %354 : vector<2x32xf32>
    %cst_136 = arith.constant -0.00295460061 : f32
    %356 = vector.broadcast %cst_136 : f32 to vector<2x32xf32>
    %357 = arith.mulf %356, %353 : vector<2x32xf32>
    %cst_137 = arith.constant -0.0160960332 : f32
    %358 = vector.broadcast %cst_137 : f32 to vector<2x32xf32>
    %359 = arith.addf %358, %357 : vector<2x32xf32>
    %cst_138 = arith.constant -5.69250624E-5 : f32
    %360 = vector.broadcast %cst_138 : f32 to vector<2x32xf32>
    %361 = arith.mulf %360, %353 : vector<2x32xf32>
    %cst_139 = arith.constant -7.34990637E-4 : f32
    %362 = vector.broadcast %cst_139 : f32 to vector<2x32xf32>
    %363 = arith.addf %362, %361 : vector<2x32xf32>
    %364 = arith.mulf %363, %354 : vector<2x32xf32>
    %365 = arith.addf %359, %364 : vector<2x32xf32>
    %cst_140 = arith.constant 2.77068146E-8 : f32
    %366 = vector.broadcast %cst_140 : f32 to vector<2x32xf32>
    %367 = arith.mulf %366, %353 : vector<2x32xf32>
    %cst_141 = arith.constant -2.10102394E-6 : f32
    %368 = vector.broadcast %cst_141 : f32 to vector<2x32xf32>
    %369 = arith.addf %368, %367 : vector<2x32xf32>
    %cst_142 = arith.constant -2.72614237E-10 : f32
    %370 = vector.broadcast %cst_142 : f32 to vector<2x32xf32>
    %371 = arith.mulf %370, %354 : vector<2x32xf32>
    %372 = arith.addf %369, %371 : vector<2x32xf32>
    %373 = arith.mulf %372, %355 : vector<2x32xf32>
    %374 = arith.addf %365, %373 : vector<2x32xf32>
    %cst_143 = arith.constant -0.00737332925 : f32
    %375 = vector.broadcast %cst_143 : f32 to vector<2x32xf32>
    %376 = arith.mulf %375, %353 : vector<2x32xf32>
    %cst_144 = arith.constant -0.0142647391 : f32
    %377 = vector.broadcast %cst_144 : f32 to vector<2x32xf32>
    %378 = arith.addf %377, %376 : vector<2x32xf32>
    %cst_145 = arith.constant -2.13374049E-4 : f32
    %379 = vector.broadcast %cst_145 : f32 to vector<2x32xf32>
    %380 = arith.mulf %379, %353 : vector<2x32xf32>
    %cst_146 = arith.constant -0.00168282702 : f32
    %381 = vector.broadcast %cst_146 : f32 to vector<2x32xf32>
    %382 = arith.addf %381, %380 : vector<2x32xf32>
    %cst_147 = arith.constant -1.45660715E-5 : f32
    %383 = vector.broadcast %cst_147 : f32 to vector<2x32xf32>
    %384 = arith.mulf %383, %354 : vector<2x32xf32>
    %385 = arith.addf %382, %384 : vector<2x32xf32>
    %386 = arith.mulf %385, %354 : vector<2x32xf32>
    %387 = arith.addf %378, %386 : vector<2x32xf32>
    %388 = arith.mulf %374, %352 : vector<2x32xf32>
    %389 = arith.divf %388, %387 : vector<2x32xf32>
    %cst_148 = arith.constant 1.000000e+00 : f32
    %390 = vector.broadcast %cst_148 : f32 to vector<2x32xf32>
    %391 = arith.addf %390, %389 : vector<2x32xf32>
    %cst_149 = arith.constant 5.000000e-01 : f32
    %392 = vector.broadcast %cst_149 : f32 to vector<2x32xf32>
    %393 = arith.mulf %392, %391 : vector<2x32xf32>
    %cst_150 = arith.constant -5.000000e-01 : f32
    %394 = vector.broadcast %cst_150 : f32 to vector<2x32xf32>
    %395 = arith.mulf %394, %346 : vector<2x32xf32>
    %396 = arith.mulf %395, %346 : vector<2x32xf32>
    %397 = math.exp %396 : vector<2x32xf32>
    %cst_151 = arith.constant 0.398942292 : f32
    %398 = vector.broadcast %cst_151 : f32 to vector<2x32xf32>
    %399 = arith.mulf %397, %398 : vector<2x32xf32>
    %400 = arith.mulf %346, %393 : vector<2x32xf32>
    %401 = arith.mulf %346, %399 : vector<2x32xf32>
    %402 = arith.addf %393, %401 : vector<2x32xf32>
    %cst_152 = arith.constant dense<0.000000e+00> : vector<2x32xf32>
    %403 = tpu.matmul %400, %4, %cst_152 {dimension_numbers = #tpu.dot_dimension_numbers<[1], [0], [0], [1], [0, 0, 1, 1], [], []>} : vector<2x32xf32>, vector<32x32xf32>, vector<2x32xf32> -> vector<2x32xf32>
    %cst_153 = arith.constant 0.000000e+00 : f32
    %404 = vector.broadcast %cst_153 : f32 to vector<2x32xf32>
    %405 = arith.subf %404, %403 : vector<2x32xf32>
    %406 = math.exp %405 : vector<2x32xf32>
    %cst_154 = arith.constant 1.000000e+00 : f32
    %407 = vector.broadcast %cst_154 : f32 to vector<2x32xf32>
    %408 = arith.addf %407, %406 : vector<2x32xf32>
    %cst_155 = arith.constant 1.000000e+00 : f32
    %409 = vector.broadcast %cst_155 : f32 to vector<2x32xf32>
    %410 = arith.divf %409, %408 : vector<2x32xf32>
    %411 = arith.mulf %410, %330 : vector<2x32xf32>
    %cst_156 = arith.constant 1.000000e+00 : f32
    %412 = vector.broadcast %cst_156 : f32 to vector<2x32xf32>
    %413 = arith.subf %412, %410 : vector<2x32xf32>
    %414 = arith.addf %411, %413 : vector<2x32xf32>
    %cst_157 = arith.constant 1.000000e+00 : f32
    %415 = vector.broadcast %cst_157 : f32 to vector<2x32xf32>
    %416 = arith.subf %330, %415 : vector<2x32xf32>
    %417 = arith.mulf %416, %410 : vector<2x32xf32>
    %cst_158 = arith.constant 1.000000e+00 : f32
    %418 = vector.broadcast %cst_158 : f32 to vector<2x32xf32>
    %419 = arith.subf %418, %410 : vector<2x32xf32>
    %420 = arith.mulf %417, %419 : vector<2x32xf32>
    %421 = tpu.concatenate %414, %402, %410, %420 in 1 : vector<2x32xf32>, vector<2x32xf32>, vector<2x32xf32>, vector<2x32xf32> -> vector<2x128xf32>
    %422 = arith.index_cast %c4_i32 : i32 to index
    %c0_159 = arith.constant 0 : index
    %c0_160 = arith.constant 0 : index
    %423 = vector.load %arg11[%422, %c0_159, %c0_160] : memref<8x2x128xf32, #tpu.memory_space<vmem>>, vector<1x2x128xf32>
    %424 = vector.shape_cast %423 : vector<1x2x128xf32> to vector<2x128xf32>
    %425 = vector.shape_cast %421 : vector<2x128xf32> to vector<1x2x128xf32>
    tpu.vector_store %arg11[%422, %c0_159, %c0_160], %425 {strides = array<i32>} : memref<8x2x128xf32, #tpu.memory_space<vmem>>, vector<1x2x128xf32>,
    %c5_i32 = arith.constant 5 : i32
    %426 = arith.index_cast %c5_i32 : i32 to index
    %c0_161 = arith.constant 0 : index
    %c0_162 = arith.constant 0 : index
    %427 = vector.load %arg1[%426, %c0_161, %c0_162] : memref<8x2x32xf32, #tpu.memory_space<vmem>>, vector<1x2x32xf32>
    %428 = vector.shape_cast %427 : vector<1x2x32xf32> to vector<2x32xf32>
    %cst_163 = arith.constant dense<0.000000e+00> : vector<2x32xf32>
    %429 = tpu.matmul %414, %3, %cst_163 {dimension_numbers = #tpu.dot_dimension_numbers<[1], [0], [0], [1], [0, 0, 1, 1], [], []>} : vector<2x32xf32>, vector<32x32xf32>, vector<2x32xf32> -> vector<2x32xf32>
    %430 = arith.addf %428, %429 : vector<2x32xf32>
    %cst_164 = arith.constant 0.707106769 : f32
    %431 = vector.broadcast %cst_164 : f32 to vector<2x32xf32>
    %432 = arith.mulf %430, %431 : vector<2x32xf32>
    %cst_165 = arith.constant -4.000000e+00 : f32
    %cst_166 = arith.constant 4.000000e+00 : f32
    %433 = vector.broadcast %cst_165 : f32 to vector<2x32xf32>
    %434 = arith.maximumf %433, %432 : vector<2x32xf32>
    %435 = vector.broadcast %cst_166 : f32 to vector<2x32xf32>
    %436 = arith.minimumf %435, %434 : vector<2x32xf32>
    %437 = arith.mulf %436, %436 : vector<2x32xf32>
    %438 = arith.mulf %437, %437 : vector<2x32xf32>
    %439 = arith.mulf %438, %438 : vector<2x32xf32>
    %cst_167 = arith.constant -0.00295460061 : f32
    %440 = vector.broadcast %cst_167 : f32 to vector<2x32xf32>
    %441 = arith.mulf %440, %437 : vector<2x32xf32>
    %cst_168 = arith.constant -0.0160960332 : f32
    %442 = vector.broadcast %cst_168 : f32 to vector<2x32xf32>
    %443 = arith.addf %442, %441 : vector<2x32xf32>
    %cst_169 = arith.constant -5.69250624E-5 : f32
    %444 = vector.broadcast %cst_169 : f32 to vector<2x32xf32>
    %445 = arith.mulf %444, %437 : vector<2x32xf32>
    %cst_170 = arith.constant -7.34990637E-4 : f32
    %446 = vector.broadcast %cst_170 : f32 to vector<2x32xf32>
    %447 = arith.addf %446, %445 : vector<2x32xf32>
    %448 = arith.mulf %447, %438 : vector<2x32xf32>
    %449 = arith.addf %443, %448 : vector<2x32xf32>
    %cst_171 = arith.constant 2.77068146E-8 : f32
    %450 = vector.broadcast %cst_171 : f32 to vector<2x32xf32>
    %451 = arith.mulf %450, %437 : vector<2x32xf32>
    %cst_172 = arith.constant -2.10102394E-6 : f32
    %452 = vector.broadcast %cst_172 : f32 to vector<2x32xf32>
    %453 = arith.addf %452, %451 : vector<2x32xf32>
    %cst_173 = arith.constant -2.72614237E-10 : f32
    %454 = vector.broadcast %cst_173 : f32 to vector<2x32xf32>
    %455 = arith.mulf %454, %438 : vector<2x32xf32>
    %456 = arith.addf %453, %455 : vector<2x32xf32>
    %457 = arith.mulf %456, %439 : vector<2x32xf32>
    %458 = arith.addf %449, %457 : vector<2x32xf32>
    %cst_174 = arith.constant -0.00737332925 : f32
    %459 = vector.broadcast %cst_174 : f32 to vector<2x32xf32>
    %460 = arith.mulf %459, %437 : vector<2x32xf32>
    %cst_175 = arith.constant -0.0142647391 : f32
    %461 = vector.broadcast %cst_175 : f32 to vector<2x32xf32>
    %462 = arith.addf %461, %460 : vector<2x32xf32>
    %cst_176 = arith.constant -2.13374049E-4 : f32
    %463 = vector.broadcast %cst_176 : f32 to vector<2x32xf32>
    %464 = arith.mulf %463, %437 : vector<2x32xf32>
    %cst_177 = arith.constant -0.00168282702 : f32
    %465 = vector.broadcast %cst_177 : f32 to vector<2x32xf32>
    %466 = arith.addf %465, %464 : vector<2x32xf32>
    %cst_178 = arith.constant -1.45660715E-5 : f32
    %467 = vector.broadcast %cst_178 : f32 to vector<2x32xf32>
    %468 = arith.mulf %467, %438 : vector<2x32xf32>
    %469 = arith.addf %466, %468 : vector<2x32xf32>
    %470 = arith.mulf %469, %438 : vector<2x32xf32>
    %471 = arith.addf %462, %470 : vector<2x32xf32>
    %472 = arith.mulf %458, %436 : vector<2x32xf32>
    %473 = arith.divf %472, %471 : vector<2x32xf32>
    %cst_179 = arith.constant 1.000000e+00 : f32
    %474 = vector.broadcast %cst_179 : f32 to vector<2x32xf32>
    %475 = arith.addf %474, %473 : vector<2x32xf32>
    %cst_180 = arith.constant 5.000000e-01 : f32
    %476 = vector.broadcast %cst_180 : f32 to vector<2x32xf32>
    %477 = arith.mulf %476, %475 : vector<2x32xf32>
    %cst_181 = arith.constant -5.000000e-01 : f32
    %478 = vector.broadcast %cst_181 : f32 to vector<2x32xf32>
    %479 = arith.mulf %478, %430 : vector<2x32xf32>
    %480 = arith.mulf %479, %430 : vector<2x32xf32>
    %481 = math.exp %480 : vector<2x32xf32>
    %cst_182 = arith.constant 0.398942292 : f32
    %482 = vector.broadcast %cst_182 : f32 to vector<2x32xf32>
    %483 = arith.mulf %481, %482 : vector<2x32xf32>
    %484 = arith.mulf %430, %477 : vector<2x32xf32>
    %485 = arith.mulf %430, %483 : vector<2x32xf32>
    %486 = arith.addf %477, %485 : vector<2x32xf32>
    %cst_183 = arith.constant dense<0.000000e+00> : vector<2x32xf32>
    %487 = tpu.matmul %484, %4, %cst_183 {dimension_numbers = #tpu.dot_dimension_numbers<[1], [0], [0], [1], [0, 0, 1, 1], [], []>} : vector<2x32xf32>, vector<32x32xf32>, vector<2x32xf32> -> vector<2x32xf32>
    %cst_184 = arith.constant 0.000000e+00 : f32
    %488 = vector.broadcast %cst_184 : f32 to vector<2x32xf32>
    %489 = arith.subf %488, %487 : vector<2x32xf32>
    %490 = math.exp %489 : vector<2x32xf32>
    %cst_185 = arith.constant 1.000000e+00 : f32
    %491 = vector.broadcast %cst_185 : f32 to vector<2x32xf32>
    %492 = arith.addf %491, %490 : vector<2x32xf32>
    %cst_186 = arith.constant 1.000000e+00 : f32
    %493 = vector.broadcast %cst_186 : f32 to vector<2x32xf32>
    %494 = arith.divf %493, %492 : vector<2x32xf32>
    %495 = arith.mulf %494, %414 : vector<2x32xf32>
    %cst_187 = arith.constant 1.000000e+00 : f32
    %496 = vector.broadcast %cst_187 : f32 to vector<2x32xf32>
    %497 = arith.subf %496, %494 : vector<2x32xf32>
    %498 = arith.addf %495, %497 : vector<2x32xf32>
    %cst_188 = arith.constant 1.000000e+00 : f32
    %499 = vector.broadcast %cst_188 : f32 to vector<2x32xf32>
    %500 = arith.subf %414, %499 : vector<2x32xf32>
    %501 = arith.mulf %500, %494 : vector<2x32xf32>
    %cst_189 = arith.constant 1.000000e+00 : f32
    %502 = vector.broadcast %cst_189 : f32 to vector<2x32xf32>
    %503 = arith.subf %502, %494 : vector<2x32xf32>
    %504 = arith.mulf %501, %503 : vector<2x32xf32>
    %505 = tpu.concatenate %498, %486, %494, %504 in 1 : vector<2x32xf32>, vector<2x32xf32>, vector<2x32xf32>, vector<2x32xf32> -> vector<2x128xf32>
    %506 = arith.index_cast %c5_i32 : i32 to index
    %c0_190 = arith.constant 0 : index
    %c0_191 = arith.constant 0 : index
    %507 = vector.load %arg11[%506, %c0_190, %c0_191] : memref<8x2x128xf32, #tpu.memory_space<vmem>>, vector<1x2x128xf32>
    %508 = vector.shape_cast %507 : vector<1x2x128xf32> to vector<2x128xf32>
    %509 = vector.shape_cast %505 : vector<2x128xf32> to vector<1x2x128xf32>
    tpu.vector_store %arg11[%506, %c0_190, %c0_191], %509 {strides = array<i32>} : memref<8x2x128xf32, #tpu.memory_space<vmem>>, vector<1x2x128xf32>,
    %c6_i32 = arith.constant 6 : i32
    %510 = arith.index_cast %c6_i32 : i32 to index
    %c0_192 = arith.constant 0 : index
    %c0_193 = arith.constant 0 : index
    %511 = vector.load %arg1[%510, %c0_192, %c0_193] : memref<8x2x32xf32, #tpu.memory_space<vmem>>, vector<1x2x32xf32>
    %512 = vector.shape_cast %511 : vector<1x2x32xf32> to vector<2x32xf32>
    %cst_194 = arith.constant dense<0.000000e+00> : vector<2x32xf32>
    %513 = tpu.matmul %498, %3, %cst_194 {dimension_numbers = #tpu.dot_dimension_numbers<[1], [0], [0], [1], [0, 0, 1, 1], [], []>} : vector<2x32xf32>, vector<32x32xf32>, vector<2x32xf32> -> vector<2x32xf32>
    %514 = arith.addf %512, %513 : vector<2x32xf32>
    %cst_195 = arith.constant 0.707106769 : f32
    %515 = vector.broadcast %cst_195 : f32 to vector<2x32xf32>
    %516 = arith.mulf %514, %515 : vector<2x32xf32>
    %cst_196 = arith.constant -4.000000e+00 : f32
    %cst_197 = arith.constant 4.000000e+00 : f32
    %517 = vector.broadcast %cst_196 : f32 to vector<2x32xf32>
    %518 = arith.maximumf %517, %516 : vector<2x32xf32>
    %519 = vector.broadcast %cst_197 : f32 to vector<2x32xf32>
    %520 = arith.minimumf %519, %518 : vector<2x32xf32>
    %521 = arith.mulf %520, %520 : vector<2x32xf32>
    %522 = arith.mulf %521, %521 : vector<2x32xf32>
    %523 = arith.mulf %522, %522 : vector<2x32xf32>
    %cst_198 = arith.constant -0.00295460061 : f32
    %524 = vector.broadcast %cst_198 : f32 to vector<2x32xf32>
    %525 = arith.mulf %524, %521 : vector<2x32xf32>
    %cst_199 = arith.constant -0.0160960332 : f32
    %526 = vector.broadcast %cst_199 : f32 to vector<2x32xf32>
    %527 = arith.addf %526, %525 : vector<2x32xf32>
    %cst_200 = arith.constant -5.69250624E-5 : f32
    %528 = vector.broadcast %cst_200 : f32 to vector<2x32xf32>
    %529 = arith.mulf %528, %521 : vector<2x32xf32>
    %cst_201 = arith.constant -7.34990637E-4 : f32
    %530 = vector.broadcast %cst_201 : f32 to vector<2x32xf32>
    %531 = arith.addf %530, %529 : vector<2x32xf32>
    %532 = arith.mulf %531, %522 : vector<2x32xf32>
    %533 = arith.addf %527, %532 : vector<2x32xf32>
    %cst_202 = arith.constant 2.77068146E-8 : f32
    %534 = vector.broadcast %cst_202 : f32 to vector<2x32xf32>
    %535 = arith.mulf %534, %521 : vector<2x32xf32>
    %cst_203 = arith.constant -2.10102394E-6 : f32
    %536 = vector.broadcast %cst_203 : f32 to vector<2x32xf32>
    %537 = arith.addf %536, %535 : vector<2x32xf32>
    %cst_204 = arith.constant -2.72614237E-10 : f32
    %538 = vector.broadcast %cst_204 : f32 to vector<2x32xf32>
    %539 = arith.mulf %538, %522 : vector<2x32xf32>
    %540 = arith.addf %537, %539 : vector<2x32xf32>
    %541 = arith.mulf %540, %523 : vector<2x32xf32>
    %542 = arith.addf %533, %541 : vector<2x32xf32>
    %cst_205 = arith.constant -0.00737332925 : f32
    %543 = vector.broadcast %cst_205 : f32 to vector<2x32xf32>
    %544 = arith.mulf %543, %521 : vector<2x32xf32>
    %cst_206 = arith.constant -0.0142647391 : f32
    %545 = vector.broadcast %cst_206 : f32 to vector<2x32xf32>
    %546 = arith.addf %545, %544 : vector<2x32xf32>
    %cst_207 = arith.constant -2.13374049E-4 : f32
    %547 = vector.broadcast %cst_207 : f32 to vector<2x32xf32>
    %548 = arith.mulf %547, %521 : vector<2x32xf32>
    %cst_208 = arith.constant -0.00168282702 : f32
    %549 = vector.broadcast %cst_208 : f32 to vector<2x32xf32>
    %550 = arith.addf %549, %548 : vector<2x32xf32>
    %cst_209 = arith.constant -1.45660715E-5 : f32
    %551 = vector.broadcast %cst_209 : f32 to vector<2x32xf32>
    %552 = arith.mulf %551, %522 : vector<2x32xf32>
    %553 = arith.addf %550, %552 : vector<2x32xf32>
    %554 = arith.mulf %553, %522 : vector<2x32xf32>
    %555 = arith.addf %546, %554 : vector<2x32xf32>
    %556 = arith.mulf %542, %520 : vector<2x32xf32>
    %557 = arith.divf %556, %555 : vector<2x32xf32>
    %cst_210 = arith.constant 1.000000e+00 : f32
    %558 = vector.broadcast %cst_210 : f32 to vector<2x32xf32>
    %559 = arith.addf %558, %557 : vector<2x32xf32>
    %cst_211 = arith.constant 5.000000e-01 : f32
    %560 = vector.broadcast %cst_211 : f32 to vector<2x32xf32>
    %561 = arith.mulf %560, %559 : vector<2x32xf32>
    %cst_212 = arith.constant -5.000000e-01 : f32
    %562 = vector.broadcast %cst_212 : f32 to vector<2x32xf32>
    %563 = arith.mulf %562, %514 : vector<2x32xf32>
    %564 = arith.mulf %563, %514 : vector<2x32xf32>
    %565 = math.exp %564 : vector<2x32xf32>
    %cst_213 = arith.constant 0.398942292 : f32
    %566 = vector.broadcast %cst_213 : f32 to vector<2x32xf32>
    %567 = arith.mulf %565, %566 : vector<2x32xf32>
    %568 = arith.mulf %514, %561 : vector<2x32xf32>
    %569 = arith.mulf %514, %567 : vector<2x32xf32>
    %570 = arith.addf %561, %569 : vector<2x32xf32>
    %cst_214 = arith.constant dense<0.000000e+00> : vector<2x32xf32>
    %571 = tpu.matmul %568, %4, %cst_214 {dimension_numbers = #tpu.dot_dimension_numbers<[1], [0], [0], [1], [0, 0, 1, 1], [], []>} : vector<2x32xf32>, vector<32x32xf32>, vector<2x32xf32> -> vector<2x32xf32>
    %cst_215 = arith.constant 0.000000e+00 : f32
    %572 = vector.broadcast %cst_215 : f32 to vector<2x32xf32>
    %573 = arith.subf %572, %571 : vector<2x32xf32>
    %574 = math.exp %573 : vector<2x32xf32>
    %cst_216 = arith.constant 1.000000e+00 : f32
    %575 = vector.broadcast %cst_216 : f32 to vector<2x32xf32>
    %576 = arith.addf %575, %574 : vector<2x32xf32>
    %cst_217 = arith.constant 1.000000e+00 : f32
    %577 = vector.broadcast %cst_217 : f32 to vector<2x32xf32>
    %578 = arith.divf %577, %576 : vector<2x32xf32>
    %579 = arith.mulf %578, %498 : vector<2x32xf32>
    %cst_218 = arith.constant 1.000000e+00 : f32
    %580 = vector.broadcast %cst_218 : f32 to vector<2x32xf32>
    %581 = arith.subf %580, %578 : vector<2x32xf32>
    %582 = arith.addf %579, %581 : vector<2x32xf32>
    %cst_219 = arith.constant 1.000000e+00 : f32
    %583 = vector.broadcast %cst_219 : f32 to vector<2x32xf32>
    %584 = arith.subf %498, %583 : vector<2x32xf32>
    %585 = arith.mulf %584, %578 : vector<2x32xf32>
    %cst_220 = arith.constant 1.000000e+00 : f32
    %586 = vector.broadcast %cst_220 : f32 to vector<2x32xf32>
    %587 = arith.subf %586, %578 : vector<2x32xf32>
    %588 = arith.mulf %585, %587 : vector<2x32xf32>
    %589 = tpu.concatenate %582, %570, %578, %588 in 1 : vector<2x32xf32>, vector<2x32xf32>, vector<2x32xf32>, vector<2x32xf32> -> vector<2x128xf32>
    %590 = arith.index_cast %c6_i32 : i32 to index
    %c0_221 = arith.constant 0 : index
    %c0_222 = arith.constant 0 : index
    %591 = vector.load %arg11[%590, %c0_221, %c0_222] : memref<8x2x128xf32, #tpu.memory_space<vmem>>, vector<1x2x128xf32>
    %592 = vector.shape_cast %591 : vector<1x2x128xf32> to vector<2x128xf32>
    %593 = vector.shape_cast %589 : vector<2x128xf32> to vector<1x2x128xf32>
    tpu.vector_store %arg11[%590, %c0_221, %c0_222], %593 {strides = array<i32>} : memref<8x2x128xf32, #tpu.memory_space<vmem>>, vector<1x2x128xf32>,
    %c7_i32 = arith.constant 7 : i32
    %594 = arith.index_cast %c7_i32 : i32 to index
    %c0_223 = arith.constant 0 : index
    %c0_224 = arith.constant 0 : index
    %595 = vector.load %arg1[%594, %c0_223, %c0_224] : memref<8x2x32xf32, #tpu.memory_space<vmem>>, vector<1x2x32xf32>
    %596 = vector.shape_cast %595 : vector<1x2x32xf32> to vector<2x32xf32>
    %cst_225 = arith.constant dense<0.000000e+00> : vector<2x32xf32>
    %597 = tpu.matmul %582, %3, %cst_225 {dimension_numbers = #tpu.dot_dimension_numbers<[1], [0], [0], [1], [0, 0, 1, 1], [], []>} : vector<2x32xf32>, vector<32x32xf32>, vector<2x32xf32> -> vector<2x32xf32>
    %598 = arith.addf %596, %597 : vector<2x32xf32>
    %cst_226 = arith.constant 0.707106769 : f32
    %599 = vector.broadcast %cst_226 : f32 to vector<2x32xf32>
    %600 = arith.mulf %598, %599 : vector<2x32xf32>
    %cst_227 = arith.constant -4.000000e+00 : f32
    %cst_228 = arith.constant 4.000000e+00 : f32
    %601 = vector.broadcast %cst_227 : f32 to vector<2x32xf32>
    %602 = arith.maximumf %601, %600 : vector<2x32xf32>
    %603 = vector.broadcast %cst_228 : f32 to vector<2x32xf32>
    %604 = arith.minimumf %603, %602 : vector<2x32xf32>
    %605 = arith.mulf %604, %604 : vector<2x32xf32>
    %606 = arith.mulf %605, %605 : vector<2x32xf32>
    %607 = arith.mulf %606, %606 : vector<2x32xf32>
    %cst_229 = arith.constant -0.00295460061 : f32
    %608 = vector.broadcast %cst_229 : f32 to vector<2x32xf32>
    %609 = arith.mulf %608, %605 : vector<2x32xf32>
    %cst_230 = arith.constant -0.0160960332 : f32
    %610 = vector.broadcast %cst_230 : f32 to vector<2x32xf32>
    %611 = arith.addf %610, %609 : vector<2x32xf32>
    %cst_231 = arith.constant -5.69250624E-5 : f32
    %612 = vector.broadcast %cst_231 : f32 to vector<2x32xf32>
    %613 = arith.mulf %612, %605 : vector<2x32xf32>
    %cst_232 = arith.constant -7.34990637E-4 : f32
    %614 = vector.broadcast %cst_232 : f32 to vector<2x32xf32>
    %615 = arith.addf %614, %613 : vector<2x32xf32>
    %616 = arith.mulf %615, %606 : vector<2x32xf32>
    %617 = arith.addf %611, %616 : vector<2x32xf32>
    %cst_233 = arith.constant 2.77068146E-8 : f32
    %618 = vector.broadcast %cst_233 : f32 to vector<2x32xf32>
    %619 = arith.mulf %618, %605 : vector<2x32xf32>
    %cst_234 = arith.constant -2.10102394E-6 : f32
    %620 = vector.broadcast %cst_234 : f32 to vector<2x32xf32>
    %621 = arith.addf %620, %619 : vector<2x32xf32>
    %cst_235 = arith.constant -2.72614237E-10 : f32
    %622 = vector.broadcast %cst_235 : f32 to vector<2x32xf32>
    %623 = arith.mulf %622, %606 : vector<2x32xf32>
    %624 = arith.addf %621, %623 : vector<2x32xf32>
    %625 = arith.mulf %624, %607 : vector<2x32xf32>
    %626 = arith.addf %617, %625 : vector<2x32xf32>
    %cst_236 = arith.constant -0.00737332925 : f32
    %627 = vector.broadcast %cst_236 : f32 to vector<2x32xf32>
    %628 = arith.mulf %627, %605 : vector<2x32xf32>
    %cst_237 = arith.constant -0.0142647391 : f32
    %629 = vector.broadcast %cst_237 : f32 to vector<2x32xf32>
    %630 = arith.addf %629, %628 : vector<2x32xf32>
    %cst_238 = arith.constant -2.13374049E-4 : f32
    %631 = vector.broadcast %cst_238 : f32 to vector<2x32xf32>
    %632 = arith.mulf %631, %605 : vector<2x32xf32>
    %cst_239 = arith.constant -0.00168282702 : f32
    %633 = vector.broadcast %cst_239 : f32 to vector<2x32xf32>
    %634 = arith.addf %633, %632 : vector<2x32xf32>
    %cst_240 = arith.constant -1.45660715E-5 : f32
    %635 = vector.broadcast %cst_240 : f32 to vector<2x32xf32>
    %636 = arith.mulf %635, %606 : vector<2x32xf32>
    %637 = arith.addf %634, %636 : vector<2x32xf32>
    %638 = arith.mulf %637, %606 : vector<2x32xf32>
    %639 = arith.addf %630, %638 : vector<2x32xf32>
    %640 = arith.mulf %626, %604 : vector<2x32xf32>
    %641 = arith.divf %640, %639 : vector<2x32xf32>
    %cst_241 = arith.constant 1.000000e+00 : f32
    %642 = vector.broadcast %cst_241 : f32 to vector<2x32xf32>
    %643 = arith.addf %642, %641 : vector<2x32xf32>
    %cst_242 = arith.constant 5.000000e-01 : f32
    %644 = vector.broadcast %cst_242 : f32 to vector<2x32xf32>
    %645 = arith.mulf %644, %643 : vector<2x32xf32>
    %cst_243 = arith.constant -5.000000e-01 : f32
    %646 = vector.broadcast %cst_243 : f32 to vector<2x32xf32>
    %647 = arith.mulf %646, %598 : vector<2x32xf32>
    %648 = arith.mulf %647, %598 : vector<2x32xf32>
    %649 = math.exp %648 : vector<2x32xf32>
    %cst_244 = arith.constant 0.398942292 : f32
    %650 = vector.broadcast %cst_244 : f32 to vector<2x32xf32>
    %651 = arith.mulf %649, %650 : vector<2x32xf32>
    %652 = arith.mulf %598, %645 : vector<2x32xf32>
    %653 = arith.mulf %598, %651 : vector<2x32xf32>
    %654 = arith.addf %645, %653 : vector<2x32xf32>
    %cst_245 = arith.constant dense<0.000000e+00> : vector<2x32xf32>
    %655 = tpu.matmul %652, %4, %cst_245 {dimension_numbers = #tpu.dot_dimension_numbers<[1], [0], [0], [1], [0, 0, 1, 1], [], []>} : vector<2x32xf32>, vector<32x32xf32>, vector<2x32xf32> -> vector<2x32xf32>
    %cst_246 = arith.constant 0.000000e+00 : f32
    %656 = vector.broadcast %cst_246 : f32 to vector<2x32xf32>
    %657 = arith.subf %656, %655 : vector<2x32xf32>
    %658 = math.exp %657 : vector<2x32xf32>
    %cst_247 = arith.constant 1.000000e+00 : f32
    %659 = vector.broadcast %cst_247 : f32 to vector<2x32xf32>
    %660 = arith.addf %659, %658 : vector<2x32xf32>
    %cst_248 = arith.constant 1.000000e+00 : f32
    %661 = vector.broadcast %cst_248 : f32 to vector<2x32xf32>
    %662 = arith.divf %661, %660 : vector<2x32xf32>
    %663 = arith.mulf %662, %582 : vector<2x32xf32>
    %cst_249 = arith.constant 1.000000e+00 : f32
    %664 = vector.broadcast %cst_249 : f32 to vector<2x32xf32>
    %665 = arith.subf %664, %662 : vector<2x32xf32>
    %666 = arith.addf %663, %665 : vector<2x32xf32>
    %cst_250 = arith.constant 1.000000e+00 : f32
    %667 = vector.broadcast %cst_250 : f32 to vector<2x32xf32>
    %668 = arith.subf %582, %667 : vector<2x32xf32>
    %669 = arith.mulf %668, %662 : vector<2x32xf32>
    %cst_251 = arith.constant 1.000000e+00 : f32
    %670 = vector.broadcast %cst_251 : f32 to vector<2x32xf32>
    %671 = arith.subf %670, %662 : vector<2x32xf32>
    %672 = arith.mulf %669, %671 : vector<2x32xf32>
    %673 = tpu.concatenate %666, %654, %662, %672 in 1 : vector<2x32xf32>, vector<2x32xf32>, vector<2x32xf32>, vector<2x32xf32> -> vector<2x128xf32>
    %674 = arith.index_cast %c7_i32 : i32 to index
    %c0_252 = arith.constant 0 : index
    %c0_253 = arith.constant 0 : index
    %675 = vector.load %arg11[%674, %c0_252, %c0_253] : memref<8x2x128xf32, #tpu.memory_space<vmem>>, vector<1x2x128xf32>
    %676 = vector.shape_cast %675 : vector<1x2x128xf32> to vector<2x128xf32>
    %677 = vector.shape_cast %673 : vector<2x128xf32> to vector<1x2x128xf32>
    tpu.vector_store %arg11[%674, %c0_252, %c0_253], %677 {strides = array<i32>} : memref<8x2x128xf32, #tpu.memory_space<vmem>>, vector<1x2x128xf32>,
    %c8_i32 = arith.constant 8 : i32
    %c0_254 = arith.constant 0 : index
    %c0_255 = arith.constant 0 : index
    %678 = vector.load %arg12[%c0_254, %c0_255] : memref<2x32xf32, #tpu.memory_space<vmem>>, vector<2x32xf32>
    tpu.vector_store %arg12[%c0_254, %c0_255], %666 {strides = array<i32>} : memref<2x32xf32, #tpu.memory_space<vmem>>, vector<2x32xf32>,
    %c0_i32_256 = arith.constant 0 : i32
    %679 = arith.cmpi eq, %arg0, %c0_i32_256 : i32
    %680 = arith.extui %679 : i1 to i32
    %c0_i32_257 = arith.constant 0 : i32
    %681 = arith.cmpi ne, %680, %c0_i32_257 : i32
    scf.if %681 {
      %c0_258 = arith.constant 0 : index
      %c0_259 = arith.constant 0 : index
      %682 = vector.load %arg7[%c0_258, %c0_259] : memref<2x32xf32, #tpu.memory_space<vmem>>, vector<2x32xf32>
      tpu.vector_store %arg7[%c0_258, %c0_259], %666 {strides = array<i32>} : memref<2x32xf32, #tpu.memory_space<vmem>>, vector<2x32xf32>,
      %c0_260 = arith.constant 0 : index
      %c0_261 = arith.constant 0 : index
      %683 = vector.load %arg5[%c0_260, %c0_261] : memref<32x32xf32, #tpu.memory_space<vmem>>, vector<32x32xf32>
      %cst_262 = arith.constant dense<0.000000e+00> : vector<2x32xf32>
      %684 = tpu.matmul %666, %683, %cst_262 {dimension_numbers = #tpu.dot_dimension_numbers<[1], [0], [0], [1], [0, 0, 1, 1], [], []>} : vector<2x32xf32>, vector<32x32xf32>, vector<2x32xf32> -> vector<2x32xf32>
      %c0_263 = arith.constant 0 : index
      %c0_264 = arith.constant 0 : index
      %685 = vector.load %arg6[%c0_263, %c0_264] : memref<1x32xf32, #tpu.memory_space<vmem>>, vector<1x32xf32>
      %686 = vector.broadcast %685 : vector<1x32xf32> to vector<2x32xf32>
      %687 = arith.addf %684, %686 : vector<2x32xf32>
      %c0_265 = arith.constant 0 : index
      %c0_266 = arith.constant 0 : index
      %688 = vector.load %arg8[%c0_265, %c0_266] : memref<2x32xf32, #tpu.memory_space<vmem>>, vector<2x32xf32>
      tpu.vector_store %arg8[%c0_265, %c0_266], %687 {strides = array<i32>} : memref<2x32xf32, #tpu.memory_space<vmem>>, vector<2x32xf32>,
      %c7 = arith.constant 7 : index
      %c0_267 = arith.constant 0 : index
      %c0_268 = arith.constant 0 : index
      %689 = vector.load %arg1[%c7, %c0_267, %c0_268] : memref<8x2x32xf32, #tpu.memory_space<vmem>>, vector<1x2x32xf32>
      %690 = vector.shape_cast %689 : vector<1x2x32xf32> to vector<2x32xf32>
      %cst_269 = arith.constant dense<0.000000e+00> : vector<2x32xf32>
      %691 = tpu.matmul %666, %3, %cst_269 {dimension_numbers = #tpu.dot_dimension_numbers<[1], [0], [0], [1], [0, 0, 1, 1], [], []>} : vector<2x32xf32>, vector<32x32xf32>, vector<2x32xf32> -> vector<2x32xf32>
      %692 = arith.addf %690, %691 : vector<2x32xf32>
      %cst_270 = arith.constant 0.707106769 : f32
      %693 = vector.broadcast %cst_270 : f32 to vector<2x32xf32>
      %694 = arith.mulf %692, %693 : vector<2x32xf32>
      %cst_271 = arith.constant -4.000000e+00 : f32
      %cst_272 = arith.constant 4.000000e+00 : f32
      %695 = vector.broadcast %cst_271 : f32 to vector<2x32xf32>
      %696 = arith.maximumf %695, %694 : vector<2x32xf32>
      %697 = vector.broadcast %cst_272 : f32 to vector<2x32xf32>
      %698 = arith.minimumf %697, %696 : vector<2x32xf32>
      %699 = arith.mulf %698, %698 : vector<2x32xf32>
      %700 = arith.mulf %699, %699 : vector<2x32xf32>
      %701 = arith.mulf %700, %700 : vector<2x32xf32>
      %cst_273 = arith.constant -0.00295460061 : f32
      %702 = vector.broadcast %cst_273 : f32 to vector<2x32xf32>
      %703 = arith.mulf %702, %699 : vector<2x32xf32>
      %cst_274 = arith.constant -0.0160960332 : f32
      %704 = vector.broadcast %cst_274 : f32 to vector<2x32xf32>
      %705 = arith.addf %704, %703 : vector<2x32xf32>
      %cst_275 = arith.constant -5.69250624E-5 : f32
      %706 = vector.broadcast %cst_275 : f32 to vector<2x32xf32>
      %707 = arith.mulf %706, %699 : vector<2x32xf32>
      %cst_276 = arith.constant -7.34990637E-4 : f32
      %708 = vector.broadcast %cst_276 : f32 to vector<2x32xf32>
      %709 = arith.addf %708, %707 : vector<2x32xf32>
      %710 = arith.mulf %709, %700 : vector<2x32xf32>
      %711 = arith.addf %705, %710 : vector<2x32xf32>
      %cst_277 = arith.constant 2.77068146E-8 : f32
      %712 = vector.broadcast %cst_277 : f32 to vector<2x32xf32>
      %713 = arith.mulf %712, %699 : vector<2x32xf32>
      %cst_278 = arith.constant -2.10102394E-6 : f32
      %714 = vector.broadcast %cst_278 : f32 to vector<2x32xf32>
      %715 = arith.addf %714, %713 : vector<2x32xf32>
      %cst_279 = arith.constant -2.72614237E-10 : f32
      %716 = vector.broadcast %cst_279 : f32 to vector<2x32xf32>
      %717 = arith.mulf %716, %700 : vector<2x32xf32>
      %718 = arith.addf %715, %717 : vector<2x32xf32>
      %719 = arith.mulf %718, %701 : vector<2x32xf32>
      %720 = arith.addf %711, %719 : vector<2x32xf32>
      %cst_280 = arith.constant -0.00737332925 : f32
      %721 = vector.broadcast %cst_280 : f32 to vector<2x32xf32>
      %722 = arith.mulf %721, %699 : vector<2x32xf32>
      %cst_281 = arith.constant -0.0142647391 : f32
      %723 = vector.broadcast %cst_281 : f32 to vector<2x32xf32>
      %724 = arith.addf %723, %722 : vector<2x32xf32>
      %cst_282 = arith.constant -2.13374049E-4 : f32
      %725 = vector.broadcast %cst_282 : f32 to vector<2x32xf32>
      %726 = arith.mulf %725, %699 : vector<2x32xf32>
      %cst_283 = arith.constant -0.00168282702 : f32
      %727 = vector.broadcast %cst_283 : f32 to vector<2x32xf32>
      %728 = arith.addf %727, %726 : vector<2x32xf32>
      %cst_284 = arith.constant -1.45660715E-5 : f32
      %729 = vector.broadcast %cst_284 : f32 to vector<2x32xf32>
      %730 = arith.mulf %729, %700 : vector<2x32xf32>
      %731 = arith.addf %728, %730 : vector<2x32xf32>
      %732 = arith.mulf %731, %700 : vector<2x32xf32>
      %733 = arith.addf %724, %732 : vector<2x32xf32>
      %734 = arith.mulf %720, %698 : vector<2x32xf32>
      %735 = arith.divf %734, %733 : vector<2x32xf32>
      %cst_285 = arith.constant 1.000000e+00 : f32
      %736 = vector.broadcast %cst_285 : f32 to vector<2x32xf32>
      %737 = arith.addf %736, %735 : vector<2x32xf32>
      %cst_286 = arith.constant 5.000000e-01 : f32
      %738 = vector.broadcast %cst_286 : f32 to vector<2x32xf32>
      %739 = arith.mulf %738, %737 : vector<2x32xf32>
      %cst_287 = arith.constant -5.000000e-01 : f32
      %740 = vector.broadcast %cst_287 : f32 to vector<2x32xf32>
      %741 = arith.mulf %740, %692 : vector<2x32xf32>
      %742 = arith.mulf %741, %692 : vector<2x32xf32>
      %743 = math.exp %742 : vector<2x32xf32>
      %cst_288 = arith.constant 0.398942292 : f32
      %744 = vector.broadcast %cst_288 : f32 to vector<2x32xf32>
      %745 = arith.mulf %743, %744 : vector<2x32xf32>
      %746 = arith.mulf %692, %739 : vector<2x32xf32>
      %747 = arith.mulf %692, %745 : vector<2x32xf32>
      %748 = arith.addf %739, %747 : vector<2x32xf32>
      %cst_289 = arith.constant dense<0.000000e+00> : vector<2x32xf32>
      %749 = tpu.matmul %746, %4, %cst_289 {dimension_numbers = #tpu.dot_dimension_numbers<[1], [0], [0], [1], [0, 0, 1, 1], [], []>} : vector<2x32xf32>, vector<32x32xf32>, vector<2x32xf32> -> vector<2x32xf32>
      %cst_290 = arith.constant 0.000000e+00 : f32
      %750 = vector.broadcast %cst_290 : f32 to vector<2x32xf32>
      %751 = arith.subf %750, %749 : vector<2x32xf32>
      %752 = math.exp %751 : vector<2x32xf32>
      %cst_291 = arith.constant 1.000000e+00 : f32
      %753 = vector.broadcast %cst_291 : f32 to vector<2x32xf32>
      %754 = arith.addf %753, %752 : vector<2x32xf32>
      %cst_292 = arith.constant 1.000000e+00 : f32
      %755 = vector.broadcast %cst_292 : f32 to vector<2x32xf32>
      %756 = arith.divf %755, %754 : vector<2x32xf32>
      %cst_293 = arith.constant 1.000000e+00 : f32
      %757 = vector.broadcast %cst_293 : f32 to vector<2x32xf32>
      %758 = arith.subf %666, %757 : vector<2x32xf32>
      %759 = arith.mulf %758, %756 : vector<2x32xf32>
      %cst_294 = arith.constant 1.000000e+00 : f32
      %760 = vector.broadcast %cst_294 : f32 to vector<2x32xf32>
      %761 = arith.subf %760, %756 : vector<2x32xf32>
      %762 = arith.mulf %759, %761 : vector<2x32xf32>
      %c0_295 = arith.constant 0 : index
      %c0_296 = arith.constant 0 : index
      %763 = vector.load %arg9[%c0_295, %c0_296] : memref<2x32xf32, #tpu.memory_space<vmem>>, vector<2x32xf32>
      tpu.vector_store %arg9[%c0_295, %c0_296], %762 {strides = array<i32>} : memref<2x32xf32, #tpu.memory_space<vmem>>, vector<2x32xf32>,
      %c0_297 = arith.constant 0 : index
      %c0_298 = arith.constant 0 : index
      %764 = vector.load %arg10[%c0_297, %c0_298] : memref<2x32xf32, #tpu.memory_space<vmem>>, vector<2x32xf32>
      tpu.vector_store %arg10[%c0_297, %c0_298], %748 {strides = array<i32>} : memref<2x32xf32, #tpu.memory_space<vmem>>, vector<2x32xf32>,
    } else {
    }
    return
  }
  func.func @transform_0(%arg0: i32) -> (i32, i32, i32) {
    %c0_i32 = arith.constant 0 : i32
    %c0_i32_0 = arith.constant 0 : i32
    %c0_i32_1 = arith.constant 0 : i32
    return %arg0, %c0_i32, %c0_i32_0 : i32, i32, i32
  }
  func.func @transform_1(%arg0: i32) -> (i32, i32) {
    %c0_i32 = arith.constant 0 : i32
    %c0_i32_0 = arith.constant 0 : i32
    %c0_i32_1 = arith.constant 0 : i32
    return %c0_i32, %c0_i32_0 : i32, i32
  }
  func.func @transform_2(%arg0: i32) -> (i32, i32) {
    %c0_i32 = arith.constant 0 : i32
    %c0_i32_0 = arith.constant 0 : i32
    %c0_i32_1 = arith.constant 0 : i32
    return %c0_i32, %c0_i32_0 : i32, i32
  }
  func.func @transform_3(%arg0: i32) -> (i32, i32) {
    %c0_i32 = arith.constant 0 : i32
    %c0_i32_0 = arith.constant 0 : i32
    %c0_i32_1 = arith.constant 0 : i32
    return %c0_i32, %c0_i32_0 : i32, i32
  }
  func.func @transform_4(%arg0: i32) -> (i32, i32) {
    %c0_i32 = arith.constant 0 : i32
    %c0_i32_0 = arith.constant 0 : i32
    %c0_i32_1 = arith.constant 0 : i32
    return %c0_i32, %c0_i32_0 : i32, i32
  }
  func.func @transform_5(%arg0: i32) -> (i32, i32) {
    %c0_i32 = arith.constant 0 : i32
    %c0_i32_0 = arith.constant 0 : i32
    %c0_i32_1 = arith.constant 0 : i32
    return %c0_i32, %c0_i32_0 : i32, i32
  }
  func.func @transform_6(%arg0: i32) -> (i32, i32) {
    %c0_i32 = arith.constant 0 : i32
    %c0_i32_0 = arith.constant 0 : i32
    %c0_i32_1 = arith.constant 0 : i32
    return %c0_i32, %c0_i32_0 : i32, i32
  }
  func.func @transform_7(%arg0: i32) -> (i32, i32) {
    %c0_i32 = arith.constant 0 : i32
    %c0_i32_0 = arith.constant 0 : i32
    %c0_i32_1 = arith.constant 0 : i32
    return %c0_i32, %c0_i32_0 : i32, i32
  }
  func.func @transform_8(%arg0: i32) -> (i32, i32) {
    %c0_i32 = arith.constant 0 : i32
    %c0_i32_0 = arith.constant 0 : i32
    %c0_i32_1 = arith.constant 0 : i32
    return %c0_i32, %c0_i32_0 : i32, i32
  }
  func.func @transform_9(%arg0: i32) -> (i32, i32) {
    %c0_i32 = arith.constant 0 : i32
    %c0_i32_0 = arith.constant 0 : i32
    %c0_i32_1 = arith.constant 0 : i32
    return %c0_i32, %c0_i32_0 : i32, i32
  }
  func.func @transform_10(%arg0: i32) -> (i32, i32, i32) {
    %c0_i32 = arith.constant 0 : i32
    %c0_i32_0 = arith.constant 0 : i32
    %c0_i32_1 = arith.constant 0 : i32
    return %arg0, %c0_i32, %c0_i32_0 : i32, i32, i32
  }
}

</mosaic_0001>

<bundles_post_ra>
// kernel: tpu_custom_call.1
= control target key start
LH: loop header
LB: loop body
LE: loop exit
PB: predicated region body
PF: predicated region fallthrough
CT: control target
= control target key end

     0   :  { %16 = vsyncpa [#allocation4], 0  ;;  %s3412_s0 = inlined_call_operand.hbm [shape: f32[8,2,32], index: 0, kind: input, shape index: {}]   ;;  %s3413_s1 = inlined_call_operand.vmem [shape: f32[2,32], index: 1, kind: input, shape index: {}]   ;;  %s3414_s2 = inlined_call_operand.hbm [shape: f32[32,32], index: 2, kind: input, shape index: {}]   ;;  %s3415_s3 = inlined_call_operand.hbm [shape: f32[32,32], index: 3, kind: input, shape index: {}]   ;;  %s3416_s4 = inlined_call_operand.hbm [shape: f32[32,32], index: 4, kind: input, shape index: {}]   ;;  %s3417_s5 = inlined_call_operand.vmem [shape: f32[1,32], index: 5, kind: input, shape index: {}]   ;;  %s3418_s6 = inlined_call_operand.hbm [shape: f32[2,32], index: 6, kind: output, shape index: {0}]   ;;  %s3419_s7 = inlined_call_operand.hbm [shape: f32[2,32], index: 7, kind: output, shape index: {1}]   ;;  %s3420_s8 = inlined_call_operand.hbm [shape: f32[2,32], index: 8, kind: output, shape index: {2}]   ;;  %s3421_s9 = inlined_call_operand.hbm [shape: f32[2,32], index: 9, kind: output, shape index: {3}]   ;;  %s3422_s10 = inlined_call_operand.hbm [shape: f32[8,2,128], index: 10, kind: output, shape index: {4}]  }
   0x1   :  { %17 = vsyncpa [#allocation7], 0 }
   0x2   :  { %18 = vsyncpa [#allocation10], 0 }
   0x3   :  { %19 = vsyncpa [#allocation5], 0 }
   0x4   :  { %20 = vsyncpa [#allocation13], 0 }
   0x5   :  { %21 = vsyncpa [#allocation16], 0  ;;  %s2955_s13 = smov [#allocation6]   ;;  %s2745_s17 = scalar_lea.hbm %s3414_s2, 512 }
   0x6   :  { %s41_s14 = sshll.u32 %s2955_s13, 4  ;;  %p2746_p0 = scmp.ne.s32.totalorder %s3414_s2, %s2745_s17  ;;  %s42_s14 = int_to_ptr.vmem [resolvable:$true] %s41_s14 }
   0x7   :  { %p2749_p1 = scmp.lt.u32.totalorder %s2745_s17, %s3414_s2 }
   0x9   :  { %p2751_p2 = pnand %p2749_p1, %p2746_p0 }
   0xb   :  { %2754 = shalt.err (!%p2751_p2)
}
   0xc   :  { %s2755_s22 = scalar_lea.vmem %s42_s14, 512  ;;  %p2760_p4 = scmp.lt.s32.totalorder %s42_s14, %s42_s14 }
   0xd   :  { %p2756_p3 = scmp.ne.s32.totalorder %s42_s14, %s2755_s22  ;;  %p2761_p5 = scmp.lt.s32.totalorder %s2755_s22, %s2755_s22 }
   0xf   :  { %p2762_p6 = por %p2761_p5, %p2760_p4 }
  0x11   :  { %p2763_p7 = pnand %p2762_p6, %p2756_p3 }
  0x13   :  { %2766 = shalt.err (!%p2763_p7)
}
  0x14   :  { %s2956_s23 = smov 128   ;;  %s2957_s24 = smov 8  }
  0x15   :  { %47 = dma.hbm_to_vmem [thread:$0]  %s3414_s2, 512, %s42_s14, [#allocation7], %s2956_s23, %s2956_s23, %s2957_s24  }
  0x16   :  { %s2958_s27 = smov [#allocation3]   ;;  %s2767_s11 = scalar_lea.hbm %s3412_s0, 256 }
  0x17   :  { %s27_s28 = sshll.u32 %s2958_s27, 4  ;;  %p2768_p8 = scmp.ne.s32.totalorder %s3412_s0, %s2767_s11  ;;  %s28_s28 = int_to_ptr.vmem [resolvable:$true] %s27_s28 }
  0x18   :  { %p2771_p9 = scmp.lt.u32.totalorder %s2767_s11, %s3412_s0 }
  0x1a   :  { %p2773_p10 = pnand %p2771_p9, %p2768_p8 }
  0x1c   :  { %2776 = shalt.err (!%p2773_p10)
}
  0x1d   :  { %s2777_s17 = scalar_lea.vmem %s28_s28, 256  ;;  %p2782_p12 = scmp.lt.s32.totalorder %s28_s28, %s28_s28 }
  0x1e   :  { %p2778_p11 = scmp.ne.s32.totalorder %s28_s28, %s2777_s17  ;;  %p2783_p13 = scmp.lt.s32.totalorder %s2777_s17, %s2777_s17 }
  0x20   :  { %p2784_p0 = por %p2783_p13, %p2782_p12 }
  0x22   :  { %p2785_p1 = pnand %p2784_p0, %p2778_p11 }
  0x24   :  { %2788 = shalt.err (!%p2785_p1)
}
  0x25   :  { %s2959_s2 = smov 32   ;;  %s2960_s14 = smov 2  }
  0x26   :  { %33 = dma.hbm_to_vmem [thread:$0]  %s3412_s0, 256, %s28_s28, [#allocation4], %s2959_s2, %s2959_s2, %s2960_s14  }
  0x27   :  { %s2961_s20 = smov [#allocation8]   ;;  %s2962_s22 = smov [#allocation9]  }
  0x28   :  { %s53_s21 = sshll.u32 %s2961_s20, 4  ;;  %s65_s25 = sshll.u32 %s2962_s22, 4  ;;  %s54_s21 = int_to_ptr.vmem [resolvable:$true] %s53_s21  ;;  %s3058_s25 = int_to_ptr.vmem [resolvable:$true] %s65_s25 }
  0x29   :  { %s2789_s29 = scalar_lea.hbm %s3415_s3, 512 }
  0x2a   :  { %p2790_p2 = scmp.ne.s32.totalorder %s3415_s3, %s2789_s29  ;;  %p2793_p3 = scmp.lt.u32.totalorder %s2789_s29, %s3415_s3 }
  0x2c   :  { %p2795_p4 = pnand %p2793_p3, %p2790_p2 }
  0x2e   :  { %2798 = shalt.err (!%p2795_p4)
}
  0x2f   :  { %s2799_s0 = scalar_lea.vmem %s54_s21, 512  ;;  %p2804_p6 = scmp.lt.s32.totalorder %s54_s21, %s54_s21 }
  0x30   :  { %p2800_p5 = scmp.ne.s32.totalorder %s54_s21, %s2799_s0  ;;  %p2805_p7 = scmp.lt.s32.totalorder %s2799_s0, %s2799_s0 }
  0x32   :  { %p2806_p8 = por %p2805_p7, %p2804_p6 }
  0x34   :  { %p2807_p9 = pnand %p2806_p8, %p2800_p5 }
  0x36   :  { %2810 = shalt.err (!%p2807_p9)
}
  0x37   :  { %59 = dma.hbm_to_vmem [thread:$0]  %s3415_s3, 512, %s54_s21, [#allocation7], %s2956_s23, %s2956_s23, %s2957_s24  }
  0x38   :  { %s2811_s18 = scalar_lea.hbm %s3416_s4, 512 }
  0x39   :  { %p2812_p10 = scmp.ne.s32.totalorder %s3416_s4, %s2811_s18  ;;  %p2815_p11 = scmp.lt.u32.totalorder %s2811_s18, %s3416_s4 }
  0x3b   :  { %p2817_p12 = pnand %p2815_p11, %p2812_p10 }
  0x3d   :  { %2820 = shalt.err (!%p2817_p12)
}
  0x3e   :  { %s2821_s27 = scalar_lea.vmem %s3058_s25, 512  ;;  %p2826_p0 = scmp.lt.s32.totalorder %s3058_s25, %s3058_s25 }
  0x3f   :  { %p2822_p13 = scmp.ne.s32.totalorder %s3058_s25, %s2821_s27  ;;  %p2827_p1 = scmp.lt.s32.totalorder %s2821_s27, %s2821_s27 }
  0x41   :  { %p2828_p2 = por %p2827_p1, %p2826_p0 }
  0x43   :  { %p2829_p3 = pnand %p2828_p2, %p2822_p13 }
  0x45   :  { %2832 = shalt.err (!%p2829_p3)
}
  0x46   :  { %71 = dma.hbm_to_vmem [thread:$0]  %s3416_s4, 512, %s3058_s25, [#allocation10], %s2956_s23, %s2956_s23, %s2957_s24  }
  0x47   :  { %2943 = dma.done.wait [#allocation4], 256  }
  0x48   :  { %2944 = vsyncadd [#allocation4], 4294967040 }
  0x49   :  { %2945 = dma.done.wait [#allocation7], 1024  }
  0x4a   :  { %2946 = vsyncadd [#allocation7], 4294966272 }
  0x4b   :  { %2947 = dma.done.wait [#allocation10], 512  }
  0x4c   :  { %2948 = vsyncadd [#allocation10], 4294966784  ;;  %v2963_v0 = vmov 0.0|0.0   ;;  %vm2964_vm0 = vmmov 0   ;;  %v2965_v1 = vmov 0.0   ;;  %vm91_vm1 = vcmask 254976  }
  0x4d   :  { %2541 = vmatprep.subr.bf16.mxu0 %v2963_v0  ;;  %2340 = vmatprep.mubr.msk.f32.mxu0 %vm2964_vm0, %v2965_v1  ;;  %v93_v2 = vld [vmem:[#allocation6] sm:$0xff]  ;;  %v94_v3 = vld [vmem:[#allocation6 + $0x8] sm:$0xff]  ;;  %v95_v4 = vld [vmem:[#allocation6 + $0x10] sm:$0xff]  ;;  %vm103_vm2 = vcmask 261120   ;;  %s2967_s24 = smov 96   ;;  %vm315_vm3 = vcmask 523264  }
  0x4e   :  { %2547 = vmatprep.subr.bf16.mxu1 %v2963_v0  ;;  %2351 = vmatprep.mubr.msk.f32.mxu1 %vm2964_vm0, %v2965_v1  ;;  %v3101_v5 = vpack.c.bf16 %v94_v3, %v93_v2  ;;  %v96_v6 = vld [vmem:[#allocation6 + $0x18] sm:$0xff]  ;;  %v90_v7 = vld [vmem:[%s3413_s1] sm:$0x3]  ;;  %v97_v10 = vld [vmem:[#allocation8] sm:$0xff]  ;;  %s2966_s1 = smov 64   ;;  %vm317_vm4 = vcmask 785408  }
  0x4f   :  { %92 = vst.msk [vmem:[#allocation2] sm:$0x3] %vm91_vm1, %v90_v7  ;;  %v3108_v8 = vpack.c.bf16 %v96_v6, %v95_v4  ;;  %v98_v11 = vld [vmem:[#allocation8 + $0x8] sm:$0xff]  ;;  %v99_v12 = vld [vmem:[#allocation8 + $0x10] sm:$0xff]  ;;  %v100_v14 = vld [vmem:[#allocation8 + $0x18] sm:$0xff]  ;;  %s2969_s11 = smov [#allocation15]  }
  0x50   :  { %2543 = vmatpush3.bf16.msra.mxu0 %v3101_v5  ;;  %v3123_v13 = vpack.c.bf16 %v98_v11, %v97_v10  ;;  %v3126_v15 = vpack.c.bf16 %v100_v14, %v99_v12  ;;  %v102_v16 = vld [vmem:[#allocation3] sm:$0x3]  ;;  %s2162_s12 = sshll.u32 %s2969_s11, 4  ;;  %s2163_s12 = int_to_ptr.vmem [resolvable:$true] %s2162_s12 }
  0x51   :  { %2544 = vmatprep.subr.bf16.mxu0 %v2963_v0 }
  0x52   :  { %2549 = vmatpush3.bf16.msra.mxu1 %v3123_v13 }
  0x53   :  { %2550 = vmatprep.subr.bf16.mxu1 %v2963_v0 }
  0x54   :  { %2546 = vmatpush3.bf16.msra.mxu0 %v3108_v8 }
  0x55   :  { %2553 = vmatprep.subr.bf16.mxu0 %v2963_v0 }
  0x56   :  { %v3113_v9 = vld [vmem:[#allocation2] sm:$0x3]  ;;  %2552 = vmatpush3.bf16.msra.mxu1 %v3126_v15 }
  0x57   :  { %2341 = vmatmul.mubr.msk.f32.vlgmr.msra.gmra.mrb[0].mxu0 %vm103_vm2, %v3113_v9  ;;  %2559 = vmatprep.subr.bf16.mxu1 %v2963_v0  ;;  %v2202_v2 = vadd.f32 -1.0, %v3113_v9 }
  0x58   :  { %2555 = vmatpush3.bf16.msra.mxu0 %v3101_v5  ;;  %2362 = vmatprep.mubr.msk.f32.mxu0 %vm2964_vm0, %v2965_v1 }
  0x59   :  { %2556 = vmatprep.subr.bf16.mxu0 %v2963_v0 }
  0x5c   :  { %2558 = vmatpush3.bf16.msra.mxu0 %v3108_v8 }
  0x5d   :  { %2565 = vmatprep.subr.bf16.mxu0 %v2963_v0 }
 0x12a   :  { %v173_v17 = vpop.f32.mrb[0].mxu0 }
 0x12b   :  { %v177_v18 = vadd.f32 %v173_v17, %v102_v16  ;;  %v2342_v19 = vpop.f32.mrb[1].mxu0 }
 0x12c   :  { %v321_v19 = vld [vmem:[#allocation3 + $0x2] sm:$0x3] }
 0x12d   :  { %v178_v20 = vmul.f32 0.70710677, %v177_v18  ;;  %v209_v23 = vmul.f32 -0.5, %v177_v18 }
 0x12f   :  { %v2200_v21 = vclamps-f32 %v178_v20, 4.0  ;;  %v210_v28 = vmul.f32 %v209_v23, %v177_v18 }
 0x131   :  { %v181_v22 = vmul.f32 %v2200_v21, %v2200_v21  ;;  %v211_v36 = vmul.f32 1.442695, %v210_v28 }
 0x133   :  { %v182_v24 = vmul.f32 %v181_v22, %v181_v22  ;;  %v186_v25 = vmul.f32 -5.6925062e-05, %v181_v22  ;;  %v190_v26 = vmul.f32 2.7706815e-08, %v181_v22  ;;  %v198_v27 = vmul.f32 -0.00021337405, %v181_v22 }
 0x134   :  { %v196_v30 = vmul.f32 -0.0073733293, %v181_v22  ;;  %v184_v37 = vmul.f32 -0.0029546006, %v181_v22  ;;  %2673 = vpow2.f32 %v211_v36 }
 0x135   :  { %v199_v29 = vadd.f32 -0.001682827, %v198_v27  ;;  %v200_v31 = vmul.f32 -1.45660715e-05, %v182_v24  ;;  %v187_v32 = vadd.f32 -0.00073499064, %v186_v25  ;;  %v183_v43 = vmul.f32 %v182_v24, %v182_v24 }
 0x136   :  { %v191_v33 = vadd.f32 -2.101024e-06, %v190_v26  ;;  %v192_v34 = vmul.f32 -2.7261424e-10, %v182_v24  ;;  %v197_v38 = vadd.f32 -0.014264739, %v196_v30 }
 0x137   :  { %v201_v35 = vadd.f32 %v200_v31, %v199_v29  ;;  %v188_v40 = vmul.f32 %v187_v32, %v182_v24  ;;  %v185_v44 = vadd.f32 -0.016096033, %v184_v37 }
 0x138   :  { %v193_v41 = vadd.f32 %v192_v34, %v191_v33 }
 0x139   :  { %v202_v39 = vmul.f32 %v201_v35, %v182_v24  ;;  %v189_v45 = vadd.f32 %v188_v40, %v185_v44 }
 0x13a   :  { %v194_v46 = vmul.f32 %v193_v41, %v183_v43 }
 0x13b   :  { %v203_v42 = vadd.f32 %v202_v39, %v197_v38 }
 0x13c   :  { %v195_v47 = vadd.f32 %v194_v46, %v189_v45 }
 0x13d   :  { %2675 = vrcp.f32 %v203_v42 }
 0x13e   :  { %v2674_v48 = vpop.eup %2673  ;;  %v204_v49 = vmul.f32 %v2200_v21, %v195_v47 }
 0x13f   :  { %v213_v52 = vmul.f32 0.3989423, %v2674_v48 }
 0x141   :  { %v215_v55 = vmul.f32 %v213_v52, %v177_v18 }
 0x147   :  { %v2676_v50 = vpop.eup %2675 }
 0x148   :  { %v206_v51 = vmul.f32 %v2676_v50, %v204_v49 }
 0x14a   :  { %v207_v53 = vadd.f32 1.0, %v206_v51 }
 0x14c   :  { %v208_v54 = vmul.f32 0.5, %v207_v53 }
 0x14e   :  { %v216_v56 = vadd.f32 %v215_v55, %v208_v54  ;;  %v214_v57 = vmul.f32 %v208_v54, %v177_v18 }
 0x150   :  { %303 = vrot.lane.b32.xlu0 %v216_v56, %s2959_s2  ;;  %2352 = vmatmul.mubr.msk.f32.vlgmr.msra.gmra.mrb[0].mxu1 %vm103_vm2, %v214_v57 }
 0x151   :  { %2561 = vmatpush3.bf16.msra.mxu1 %v3123_v13  ;;  %2373 = vmatprep.mubr.msk.f32.mxu1 %vm2964_vm0, %v2965_v1 }
 0x152   :  { %2562 = vmatprep.subr.bf16.mxu1 %v2963_v0 }
 0x155   :  { %2564 = vmatpush3.bf16.msra.mxu1 %v3126_v15 }
 0x156   :  { %2571 = vmatprep.subr.bf16.mxu1 %v2963_v0 }
 0x223   :  { %v286_v58 = vpop.f32.mrb[0].mxu1 }
 0x224   :  { %v290_v59 = vsub.f32 0.0, %v286_v58  ;;  %v2353_v60 = vpop.f32.mrb[1].mxu1 }
 0x226   :  { %v291_v61 = vmul.f32 1.442695, %v290_v59 }
 0x228   :  { %2677 = vpow2.f32 %v291_v61 }
 0x232   :  { %v2678_v62 = vpop.eup %2677 }
 0x233   :  { %v293_v63 = vadd.f32 1.0, %v2678_v62 }
 0x235   :  { %2679 = vrcp.f32 %v293_v63 }
 0x23f   :  { %v2680_v3 = vpop.eup %2679 }
 0x240   :  { %307 = vrot.lane.b32.xlu0 %v2680_v3, %s2966_s1  ;;  %v297_v4 = vsub.f32 1.0, %v2680_v3  ;;  %v300_v6 = vmul.f32 %v2680_v3, %v2202_v2  ;;  %v296_v7 = vmul.f32 %v2680_v3, %v3113_v9  ;;  %v304_v9 = vpop.permute.xlu0 %303 }
 0x242   :  { %v301_v10 = vmul.f32 %v300_v6, %v297_v4  ;;  %v3142_v11 = vadd.f32 %v297_v4, %v296_v7 }
 0x244   :  { %311 = vrot.lane.b32.xlu0 %v301_v10, %s2967_s24  ;;  %2363 = vmatmul.mubr.msk.f32.vlgmr.msra.gmra.mrb[2].mxu0 %vm103_vm2, %v3142_v11  ;;  %v314_v14 = vsel %vm103_vm2, %v3142_v11, %v304_v9  ;;  %v2206_v6 = vadd.f32 -1.0, %v3142_v11 }
 0x245   :  { %2567 = vmatpush3.bf16.msra.mxu0 %v3101_v5  ;;  %2384 = vmatprep.mubr.msk.f32.mxu0 %vm2964_vm0, %v2965_v1 }
 0x246   :  { %2568 = vmatprep.subr.bf16.mxu0 %v2963_v0 }
 0x249   :  { %2570 = vmatpush3.bf16.msra.mxu0 %v3108_v8 }
 0x24a   :  { %2577 = vmatprep.subr.bf16.mxu0 %v2963_v0 }
 0x2b2   :  { %v308_v12 = vpop.permute.xlu0 %307 }
 0x2b3   :  { %v316_v16 = vsel %vm315_vm3, %v314_v14, %v308_v12 }
 0x2b6   :  { %v312_v17 = vpop.permute.xlu0 %311 }
 0x2b7   :  { %v318_v18 = vsel %vm317_vm4, %v316_v16, %v312_v17 }
 0x2b8   :  { %319 = vst [vmem:[#allocation17] sm:$0x3] %v318_v18 }
 0x317   :  { %v391_v20 = vpop.f32.mrb[2].mxu0 }
 0x318   :  { %v395_v21 = vadd.f32 %v391_v20, %v321_v19  ;;  %v2364_v22 = vpop.f32.mrb[3].mxu0 }
 0x319   :  { %v538_v22 = vld [vmem:[#allocation3 + $0x4] sm:$0x3] }
 0x31a   :  { %v396_v23 = vmul.f32 0.70710677, %v395_v21  ;;  %v427_v26 = vmul.f32 -0.5, %v395_v21 }
 0x31c   :  { %v2204_v24 = vclamps-f32 %v396_v23, 4.0  ;;  %v428_v31 = vmul.f32 %v427_v26, %v395_v21 }
 0x31e   :  { %v399_v25 = vmul.f32 %v2204_v24, %v2204_v24  ;;  %v429_v39 = vmul.f32 1.442695, %v428_v31 }
 0x320   :  { %v400_v27 = vmul.f32 %v399_v25, %v399_v25  ;;  %v404_v28 = vmul.f32 -5.6925062e-05, %v399_v25  ;;  %v408_v29 = vmul.f32 2.7706815e-08, %v399_v25  ;;  %v416_v30 = vmul.f32 -0.00021337405, %v399_v25 }
 0x321   :  { %v414_v33 = vmul.f32 -0.0073733293, %v399_v25  ;;  %v402_v40 = vmul.f32 -0.0029546006, %v399_v25  ;;  %2681 = vpow2.f32 %v429_v39 }
 0x322   :  { %v417_v32 = vadd.f32 -0.001682827, %v416_v30  ;;  %v418_v34 = vmul.f32 -1.45660715e-05, %v400_v27  ;;  %v405_v35 = vadd.f32 -0.00073499064, %v404_v28  ;;  %v401_v46 = vmul.f32 %v400_v27, %v400_v27 }
 0x323   :  { %v409_v36 = vadd.f32 -2.101024e-06, %v408_v29  ;;  %v410_v37 = vmul.f32 -2.7261424e-10, %v400_v27  ;;  %v415_v41 = vadd.f32 -0.014264739, %v414_v33 }
 0x324   :  { %v419_v38 = vadd.f32 %v418_v34, %v417_v32  ;;  %v406_v43 = vmul.f32 %v405_v35, %v400_v27  ;;  %v403_v47 = vadd.f32 -0.016096033, %v402_v40 }
 0x325   :  { %v411_v44 = vadd.f32 %v410_v37, %v409_v36 }
 0x326   :  { %v420_v42 = vmul.f32 %v419_v38, %v400_v27  ;;  %v407_v48 = vadd.f32 %v406_v43, %v403_v47 }
 0x327   :  { %v412_v49 = vmul.f32 %v411_v44, %v401_v46 }
 0x328   :  { %v421_v45 = vadd.f32 %v420_v42, %v415_v41 }
 0x329   :  { %v413_v50 = vadd.f32 %v412_v49, %v407_v48 }
 0x32a   :  { %2683 = vrcp.f32 %v421_v45 }
 0x32b   :  { %v2682_v51 = vpop.eup %2681  ;;  %v422_v52 = vmul.f32 %v2204_v24, %v413_v50 }
 0x32c   :  { %v431_v55 = vmul.f32 0.3989423, %v2682_v51 }
 0x32e   :  { %v433_v58 = vmul.f32 %v431_v55, %v395_v21 }
 0x334   :  { %v2684_v53 = vpop.eup %2683 }
 0x335   :  { %v424_v54 = vmul.f32 %v2684_v53, %v422_v52 }
 0x337   :  { %v425_v56 = vadd.f32 1.0, %v424_v54 }
 0x339   :  { %v426_v57 = vmul.f32 0.5, %v425_v56 }
 0x33b   :  { %v434_v59 = vadd.f32 %v433_v58, %v426_v57  ;;  %v432_v60 = vmul.f32 %v426_v57, %v395_v21 }
 0x33d   :  { %521 = vrot.lane.b32.xlu0 %v434_v59, %s2959_s2  ;;  %2374 = vmatmul.mubr.msk.f32.vlgmr.msra.gmra.mrb[2].mxu1 %vm103_vm2, %v432_v60 }
 0x33e   :  { %2573 = vmatpush3.bf16.msra.mxu1 %v3123_v13  ;;  %2395 = vmatprep.mubr.msk.f32.mxu1 %vm2964_vm0, %v2965_v1 }
 0x33f   :  { %2574 = vmatprep.subr.bf16.mxu1 %v2963_v0 }
 0x342   :  { %2576 = vmatpush3.bf16.msra.mxu1 %v3126_v15 }
 0x343   :  { %2583 = vmatprep.subr.bf16.mxu1 %v2963_v0 }
 0x3af   :  { %v522_v17 = vpop.permute.xlu0 %521 }
 0x410   :  { %v504_v61 = vpop.f32.mrb[2].mxu1 }
 0x411   :  { %v508_v62 = vsub.f32 0.0, %v504_v61  ;;  %v2375_v63 = vpop.f32.mrb[3].mxu1 }
 0x413   :  { %v509_v2 = vmul.f32 1.442695, %v508_v62 }
 0x415   :  { %2685 = vpow2.f32 %v509_v2 }
 0x41f   :  { %v2686_v3 = vpop.eup %2685 }
 0x420   :  { %v511_v4 = vadd.f32 1.0, %v2686_v3 }
 0x422   :  { %2687 = vrcp.f32 %v511_v4 }
 0x42c   :  { %v2688_v7 = vpop.eup %2687 }
 0x42d   :  { %525 = vrot.lane.b32.xlu1 %v2688_v7, %s2966_s1  ;;  %v515_v10 = vsub.f32 1.0, %v2688_v7  ;;  %v518_v9 = vmul.f32 %v2688_v7, %v2206_v6  ;;  %v514_v12 = vmul.f32 %v2688_v7, %v3142_v11 }
 0x42f   :  { %v519_v14 = vmul.f32 %v518_v9, %v515_v10  ;;  %v3168_v16 = vadd.f32 %v515_v10, %v514_v12 }
 0x431   :  { %529 = vrot.lane.b32.xlu1 %v519_v14, %s2967_s24  ;;  %2385 = vmatmul.mubr.msk.f32.vlgmr.msra.gmra.mrb[4].mxu0 %vm103_vm2, %v3168_v16  ;;  %v532_v18 = vsel %vm103_vm2, %v3168_v16, %v522_v17  ;;  %v2210_v9 = vadd.f32 -1.0, %v3168_v16 }
 0x432   :  { %2579 = vmatpush3.bf16.msra.mxu0 %v3101_v5  ;;  %2406 = vmatprep.mubr.msk.f32.mxu0 %vm2964_vm0, %v2965_v1 }
 0x433   :  { %2580 = vmatprep.subr.bf16.mxu0 %v2963_v0 }
 0x436   :  { %2582 = vmatpush3.bf16.msra.mxu0 %v3108_v8 }
 0x437   :  { %2589 = vmatprep.subr.bf16.mxu0 %v2963_v0 }
 0x49f   :  { %v526_v11 = vpop.permute.xlu1 %525 }
 0x4a0   :  { %v533_v19 = vsel %vm315_vm3, %v532_v18, %v526_v11 }
 0x4a3   :  { %v530_v20 = vpop.permute.xlu1 %529 }
 0x4a4   :  { %v534_v21 = vsel %vm317_vm4, %v533_v19, %v530_v20 }
 0x4a5   :  { %536 = vst [vmem:[#allocation17 + $0x2] sm:$0x3] %v534_v21 }
 0x504   :  { %v608_v23 = vpop.f32.mrb[4].mxu0 }
 0x505   :  { %v612_v24 = vadd.f32 %v608_v23, %v538_v22  ;;  %v2386_v25 = vpop.f32.mrb[5].mxu0 }
 0x506   :  { %v755_v25 = vld [vmem:[#allocation3 + $0x6] sm:$0x3] }
 0x507   :  { %v613_v26 = vmul.f32 0.70710677, %v612_v24  ;;  %v644_v29 = vmul.f32 -0.5, %v612_v24 }
 0x509   :  { %v2208_v27 = vclamps-f32 %v613_v26, 4.0  ;;  %v645_v34 = vmul.f32 %v644_v29, %v612_v24 }
 0x50b   :  { %v616_v28 = vmul.f32 %v2208_v27, %v2208_v27  ;;  %v646_v42 = vmul.f32 1.442695, %v645_v34 }
 0x50d   :  { %v617_v30 = vmul.f32 %v616_v28, %v616_v28  ;;  %v621_v31 = vmul.f32 -5.6925062e-05, %v616_v28  ;;  %v625_v32 = vmul.f32 2.7706815e-08, %v616_v28  ;;  %v633_v33 = vmul.f32 -0.00021337405, %v616_v28 }
 0x50e   :  { %v631_v36 = vmul.f32 -0.0073733293, %v616_v28  ;;  %v619_v43 = vmul.f32 -0.0029546006, %v616_v28  ;;  %2689 = vpow2.f32 %v646_v42 }
 0x50f   :  { %v634_v35 = vadd.f32 -0.001682827, %v633_v33  ;;  %v635_v37 = vmul.f32 -1.45660715e-05, %v617_v30  ;;  %v622_v38 = vadd.f32 -0.00073499064, %v621_v31  ;;  %v618_v49 = vmul.f32 %v617_v30, %v617_v30 }
 0x510   :  { %v626_v39 = vadd.f32 -2.101024e-06, %v625_v32  ;;  %v627_v40 = vmul.f32 -2.7261424e-10, %v617_v30  ;;  %v632_v44 = vadd.f32 -0.014264739, %v631_v36 }
 0x511   :  { %v636_v41 = vadd.f32 %v635_v37, %v634_v35  ;;  %v623_v46 = vmul.f32 %v622_v38, %v617_v30  ;;  %v620_v50 = vadd.f32 -0.016096033, %v619_v43 }
 0x512   :  { %v628_v47 = vadd.f32 %v627_v40, %v626_v39 }
 0x513   :  { %v637_v45 = vmul.f32 %v636_v41, %v617_v30  ;;  %v624_v51 = vadd.f32 %v623_v46, %v620_v50 }
 0x514   :  { %v629_v52 = vmul.f32 %v628_v47, %v618_v49 }
 0x515   :  { %v638_v48 = vadd.f32 %v637_v45, %v632_v44 }
 0x516   :  { %v630_v53 = vadd.f32 %v629_v52, %v624_v51 }
 0x517   :  { %2691 = vrcp.f32 %v638_v48 }
 0x518   :  { %v2690_v54 = vpop.eup %2689  ;;  %v639_v55 = vmul.f32 %v2208_v27, %v630_v53 }
 0x519   :  { %v648_v58 = vmul.f32 0.3989423, %v2690_v54 }
 0x51b   :  { %v650_v61 = vmul.f32 %v648_v58, %v612_v24 }
 0x521   :  { %v2692_v56 = vpop.eup %2691 }
 0x522   :  { %v641_v57 = vmul.f32 %v2692_v56, %v639_v55 }
 0x524   :  { %v642_v59 = vadd.f32 1.0, %v641_v57 }
 0x526   :  { %v643_v60 = vmul.f32 0.5, %v642_v59 }
 0x528   :  { %v651_v62 = vadd.f32 %v650_v61, %v643_v60  ;;  %v649_v63 = vmul.f32 %v643_v60, %v612_v24 }
 0x52a   :  { %738 = vrot.lane.b32.xlu1 %v651_v62, %s2959_s2  ;;  %2396 = vmatmul.mubr.msk.f32.vlgmr.msra.gmra.mrb[4].mxu1 %vm103_vm2, %v649_v63 }
 0x52b   :  { %2585 = vmatpush3.bf16.msra.mxu1 %v3123_v13  ;;  %2417 = vmatprep.mubr.msk.f32.mxu1 %vm2964_vm0, %v2965_v1 }
 0x52c   :  { %2586 = vmatprep.subr.bf16.mxu1 %v2963_v0 }
 0x52f   :  { %2588 = vmatpush3.bf16.msra.mxu1 %v3126_v15 }
 0x530   :  { %2595 = vmatprep.subr.bf16.mxu1 %v2963_v0 }
 0x59c   :  { %v739_v20 = vpop.permute.xlu1 %738 }
 0x5fd   :  { %v721_v2 = vpop.f32.mrb[4].mxu1 }
 0x5fe   :  { %v725_v3 = vsub.f32 0.0, %v721_v2  ;;  %v2397_v4 = vpop.f32.mrb[5].mxu1 }
 0x600   :  { %v726_v6 = vmul.f32 1.442695, %v725_v3 }
 0x602   :  { %2693 = vpow2.f32 %v726_v6 }
 0x60c   :  { %v2694_v7 = vpop.eup %2693 }
 0x60d   :  { %v728_v10 = vadd.f32 1.0, %v2694_v7 }
 0x60f   :  { %2695 = vrcp.f32 %v728_v10 }
 0x619   :  { %v2696_v12 = vpop.eup %2695 }
 0x61a   :  { %742 = vrot.lane.b32.xlu0 %v2696_v12, %s2966_s1  ;;  %v732_v14 = vsub.f32 1.0, %v2696_v12  ;;  %v735_v11 = vmul.f32 %v2696_v12, %v2210_v9  ;;  %v731_v17 = vmul.f32 %v2696_v12, %v3168_v16 }
 0x61c   :  { %v736_v18 = vmul.f32 %v735_v11, %v732_v14  ;;  %v3194_v19 = vadd.f32 %v732_v14, %v731_v17 }
 0x61e   :  { %746 = vrot.lane.b32.xlu0 %v736_v18, %s2967_s24  ;;  %2407 = vmatmul.mubr.msk.f32.vlgmr.msra.gmra.mrb[6].mxu0 %vm103_vm2, %v3194_v19  ;;  %v749_v21 = vsel %vm103_vm2, %v3194_v19, %v739_v20  ;;  %v2214_v11 = vadd.f32 -1.0, %v3194_v19 }
 0x61f   :  { %2591 = vmatpush3.bf16.msra.mxu0 %v3101_v5  ;;  %2428 = vmatprep.mubr.msk.f32.mxu0 %vm2964_vm0, %v2965_v1 }
 0x620   :  { %2592 = vmatprep.subr.bf16.mxu0 %v2963_v0 }
 0x623   :  { %2594 = vmatpush3.bf16.msra.mxu0 %v3108_v8 }
 0x624   :  { %2601 = vmatprep.subr.bf16.mxu0 %v2963_v0 }
 0x68c   :  { %v743_v16 = vpop.permute.xlu0 %742 }
 0x68d   :  { %v750_v22 = vsel %vm315_vm3, %v749_v21, %v743_v16 }
 0x690   :  { %v747_v23 = vpop.permute.xlu0 %746 }
 0x691   :  { %v751_v24 = vsel %vm317_vm4, %v750_v22, %v747_v23 }
 0x692   :  { %753 = vst [vmem:[#allocation17 + $0x4] sm:$0x3] %v751_v24 }
 0x6f1   :  { %v825_v26 = vpop.f32.mrb[6].mxu0 }
 0x6f2   :  { %v829_v27 = vadd.f32 %v825_v26, %v755_v25  ;;  %v2408_v28 = vpop.f32.mrb[7].mxu0 }
 0x6f3   :  { %v972_v28 = vld [vmem:[#allocation3 + $0x8] sm:$0x3] }
 0x6f4   :  { %v830_v29 = vmul.f32 0.70710677, %v829_v27  ;;  %v861_v32 = vmul.f32 -0.5, %v829_v27 }
 0x6f6   :  { %v2212_v30 = vclamps-f32 %v830_v29, 4.0  ;;  %v862_v37 = vmul.f32 %v861_v32, %v829_v27 }
 0x6f8   :  { %v833_v31 = vmul.f32 %v2212_v30, %v2212_v30  ;;  %v863_v45 = vmul.f32 1.442695, %v862_v37 }
 0x6fa   :  { %v834_v33 = vmul.f32 %v833_v31, %v833_v31  ;;  %v838_v34 = vmul.f32 -5.6925062e-05, %v833_v31  ;;  %v842_v35 = vmul.f32 2.7706815e-08, %v833_v31  ;;  %v850_v36 = vmul.f32 -0.00021337405, %v833_v31 }
 0x6fb   :  { %v848_v39 = vmul.f32 -0.0073733293, %v833_v31  ;;  %v836_v46 = vmul.f32 -0.0029546006, %v833_v31  ;;  %2697 = vpow2.f32 %v863_v45 }
 0x6fc   :  { %v851_v38 = vadd.f32 -0.001682827, %v850_v36  ;;  %v852_v40 = vmul.f32 -1.45660715e-05, %v834_v33  ;;  %v839_v41 = vadd.f32 -0.00073499064, %v838_v34  ;;  %v835_v52 = vmul.f32 %v834_v33, %v834_v33 }
 0x6fd   :  { %v843_v42 = vadd.f32 -2.101024e-06, %v842_v35  ;;  %v844_v43 = vmul.f32 -2.7261424e-10, %v834_v33  ;;  %v849_v47 = vadd.f32 -0.014264739, %v848_v39 }
 0x6fe   :  { %v853_v44 = vadd.f32 %v852_v40, %v851_v38  ;;  %v840_v49 = vmul.f32 %v839_v41, %v834_v33  ;;  %v837_v53 = vadd.f32 -0.016096033, %v836_v46 }
 0x6ff   :  { %v845_v50 = vadd.f32 %v844_v43, %v843_v42 }
 0x700   :  { %v854_v48 = vmul.f32 %v853_v44, %v834_v33  ;;  %v841_v54 = vadd.f32 %v840_v49, %v837_v53 }
 0x701   :  { %v846_v55 = vmul.f32 %v845_v50, %v835_v52 }
 0x702   :  { %v855_v51 = vadd.f32 %v854_v48, %v849_v47 }
 0x703   :  { %v847_v56 = vadd.f32 %v846_v55, %v841_v54 }
 0x704   :  { %2699 = vrcp.f32 %v855_v51 }
 0x705   :  { %v2698_v57 = vpop.eup %2697  ;;  %v856_v58 = vmul.f32 %v2212_v30, %v847_v56 }
 0x706   :  { %v865_v61 = vmul.f32 0.3989423, %v2698_v57 }
 0x708   :  { %v867_v2 = vmul.f32 %v865_v61, %v829_v27 }
 0x70e   :  { %v2700_v59 = vpop.eup %2699 }
 0x70f   :  { %v858_v60 = vmul.f32 %v2700_v59, %v856_v58 }
 0x711   :  { %v859_v62 = vadd.f32 1.0, %v858_v60 }
 0x713   :  { %v860_v63 = vmul.f32 0.5, %v859_v62 }
 0x715   :  { %v868_v3 = vadd.f32 %v867_v2, %v860_v63  ;;  %v866_v4 = vmul.f32 %v860_v63, %v829_v27 }
 0x717   :  { %955 = vrot.lane.b32.xlu1 %v868_v3, %s2959_s2  ;;  %2418 = vmatmul.mubr.msk.f32.vlgmr.msra.gmra.mrb[6].mxu1 %vm103_vm2, %v866_v4 }
 0x718   :  { %2597 = vmatpush3.bf16.msra.mxu1 %v3123_v13  ;;  %2439 = vmatprep.mubr.msk.f32.mxu1 %vm2964_vm0, %v2965_v1 }
 0x719   :  { %2598 = vmatprep.subr.bf16.mxu1 %v2963_v0 }
 0x71c   :  { %2600 = vmatpush3.bf16.msra.mxu1 %v3126_v15 }
 0x71d   :  { %2607 = vmatprep.subr.bf16.mxu1 %v2963_v0 }
 0x7ea   :  { %v938_v6 = vpop.f32.mrb[6].mxu1 }
 0x7eb   :  { %v942_v7 = vsub.f32 0.0, %v938_v6  ;;  %v2419_v10 = vpop.f32.mrb[7].mxu1 }
 0x7ed   :  { %v943_v9 = vmul.f32 1.442695, %v942_v7 }
 0x7ef   :  { %2701 = vpow2.f32 %v943_v9 }
 0x7f9   :  { %v2702_v12 = vpop.eup %2701 }
 0x7fa   :  { %v945_v14 = vadd.f32 1.0, %v2702_v12 }
 0x7fc   :  { %2703 = vrcp.f32 %v945_v14 }
 0x806   :  { %v2704_v17 = vpop.eup %2703 }
 0x807   :  { %959 = vrot.lane.b32.xlu1 %v2704_v17, %s2966_s1  ;;  %v949_v18 = vsub.f32 1.0, %v2704_v17  ;;  %v952_v16 = vmul.f32 %v2704_v17, %v2214_v11  ;;  %v948_v20 = vmul.f32 %v2704_v17, %v3194_v19  ;;  %v956_v19 = vpop.permute.xlu1 %955 }
 0x809   :  { %v953_v21 = vmul.f32 %v952_v16, %v949_v18  ;;  %v3220_v22 = vadd.f32 %v949_v18, %v948_v20 }
 0x80b   :  { %963 = vrot.lane.b32.xlu1 %v953_v21, %s2967_s24  ;;  %2429 = vmatmul.mubr.msk.f32.vlgmr.msra.gmra.mrb[8].mxu0 %vm103_vm2, %v3220_v22  ;;  %v966_v24 = vsel %vm103_vm2, %v3220_v22, %v956_v19  ;;  %v2218_v16 = vadd.f32 -1.0, %v3220_v22 }
 0x80c   :  { %2603 = vmatpush3.bf16.msra.mxu0 %v3101_v5  ;;  %2450 = vmatprep.mubr.msk.f32.mxu0 %vm2964_vm0, %v2965_v1 }
 0x80d   :  { %2604 = vmatprep.subr.bf16.mxu0 %v2963_v0 }
 0x810   :  { %2606 = vmatpush3.bf16.msra.mxu0 %v3108_v8 }
 0x811   :  { %2613 = vmatprep.subr.bf16.mxu0 %v2963_v0 }
 0x879   :  { %v960_v23 = vpop.permute.xlu1 %959 }
 0x87a   :  { %v967_v25 = vsel %vm315_vm3, %v966_v24, %v960_v23 }
 0x87d   :  { %v964_v26 = vpop.permute.xlu1 %963 }
 0x87e   :  { %v968_v27 = vsel %vm317_vm4, %v967_v25, %v964_v26 }
 0x87f   :  { %970 = vst [vmem:[#allocation17 + $0x6] sm:$0x3] %v968_v27 }
 0x8de   :  { %v1042_v29 = vpop.f32.mrb[8].mxu0 }
 0x8df   :  { %v1046_v30 = vadd.f32 %v1042_v29, %v972_v28  ;;  %v2430_v31 = vpop.f32.mrb[9].mxu0 }
 0x8e0   :  { %v1189_v31 = vld [vmem:[#allocation3 + $0xa] sm:$0x3] }
 0x8e1   :  { %v1047_v32 = vmul.f32 0.70710677, %v1046_v30  ;;  %v1078_v35 = vmul.f32 -0.5, %v1046_v30 }
 0x8e3   :  { %v2216_v33 = vclamps-f32 %v1047_v32, 4.0  ;;  %v1079_v40 = vmul.f32 %v1078_v35, %v1046_v30 }
 0x8e5   :  { %v1050_v34 = vmul.f32 %v2216_v33, %v2216_v33  ;;  %v1080_v48 = vmul.f32 1.442695, %v1079_v40 }
 0x8e7   :  { %v1051_v36 = vmul.f32 %v1050_v34, %v1050_v34  ;;  %v1055_v37 = vmul.f32 -5.6925062e-05, %v1050_v34  ;;  %v1059_v38 = vmul.f32 2.7706815e-08, %v1050_v34  ;;  %v1067_v39 = vmul.f32 -0.00021337405, %v1050_v34 }
 0x8e8   :  { %v1065_v42 = vmul.f32 -0.0073733293, %v1050_v34  ;;  %v1053_v49 = vmul.f32 -0.0029546006, %v1050_v34  ;;  %2705 = vpow2.f32 %v1080_v48 }
 0x8e9   :  { %v1068_v41 = vadd.f32 -0.001682827, %v1067_v39  ;;  %v1069_v43 = vmul.f32 -1.45660715e-05, %v1051_v36  ;;  %v1056_v44 = vadd.f32 -0.00073499064, %v1055_v37  ;;  %v1052_v55 = vmul.f32 %v1051_v36, %v1051_v36 }
 0x8ea   :  { %v1060_v45 = vadd.f32 -2.101024e-06, %v1059_v38  ;;  %v1061_v46 = vmul.f32 -2.7261424e-10, %v1051_v36  ;;  %v1066_v50 = vadd.f32 -0.014264739, %v1065_v42 }
 0x8eb   :  { %v1070_v47 = vadd.f32 %v1069_v43, %v1068_v41  ;;  %v1057_v52 = vmul.f32 %v1056_v44, %v1051_v36  ;;  %v1054_v56 = vadd.f32 -0.016096033, %v1053_v49 }
 0x8ec   :  { %v1062_v53 = vadd.f32 %v1061_v46, %v1060_v45 }
 0x8ed   :  { %v1071_v51 = vmul.f32 %v1070_v47, %v1051_v36  ;;  %v1058_v57 = vadd.f32 %v1057_v52, %v1054_v56 }
 0x8ee   :  { %v1063_v58 = vmul.f32 %v1062_v53, %v1052_v55 }
 0x8ef   :  { %v1072_v54 = vadd.f32 %v1071_v51, %v1066_v50 }
 0x8f0   :  { %v1064_v59 = vadd.f32 %v1063_v58, %v1058_v57 }
 0x8f1   :  { %2707 = vrcp.f32 %v1072_v54 }
 0x8f2   :  { %v2706_v60 = vpop.eup %2705  ;;  %v1073_v61 = vmul.f32 %v2216_v33, %v1064_v59 }
 0x8f3   :  { %v1082_v2 = vmul.f32 0.3989423, %v2706_v60 }
 0x8f5   :  { %v1084_v6 = vmul.f32 %v1082_v2, %v1046_v30 }
 0x8fb   :  { %v2708_v62 = vpop.eup %2707 }
 0x8fc   :  { %v1075_v63 = vmul.f32 %v2708_v62, %v1073_v61 }
 0x8fe   :  { %v1076_v3 = vadd.f32 1.0, %v1075_v63 }
 0x900   :  { %v1077_v4 = vmul.f32 0.5, %v1076_v3 }
 0x902   :  { %v1085_v7 = vadd.f32 %v1084_v6, %v1077_v4  ;;  %v1083_v10 = vmul.f32 %v1077_v4, %v1046_v30 }
 0x904   :  { %1172 = vrot.lane.b32.xlu0 %v1085_v7, %s2959_s2  ;;  %2440 = vmatmul.mubr.msk.f32.vlgmr.msra.gmra.mrb[8].mxu1 %vm103_vm2, %v1083_v10 }
 0x905   :  { %2609 = vmatpush3.bf16.msra.mxu1 %v3123_v13  ;;  %2461 = vmatprep.mubr.msk.f32.mxu1 %vm2964_vm0, %v2965_v1 }
 0x906   :  { %2610 = vmatprep.subr.bf16.mxu1 %v2963_v0 }
 0x909   :  { %2612 = vmatpush3.bf16.msra.mxu1 %v3126_v15 }
 0x90a   :  { %2619 = vmatprep.subr.bf16.mxu1 %v2963_v0 }
 0x9d7   :  { %v1155_v9 = vpop.f32.mrb[8].mxu1 }
 0x9d8   :  { %v1159_v12 = vsub.f32 0.0, %v1155_v9  ;;  %v2441_v14 = vpop.f32.mrb[9].mxu1 }
 0x9da   :  { %v1160_v11 = vmul.f32 1.442695, %v1159_v12 }
 0x9dc   :  { %2709 = vpow2.f32 %v1160_v11 }
 0x9e6   :  { %v2710_v17 = vpop.eup %2709 }
 0x9e7   :  { %v1162_v18 = vadd.f32 1.0, %v2710_v17 }
 0x9e9   :  { %2711 = vrcp.f32 %v1162_v18 }
 0x9f3   :  { %v2712_v20 = vpop.eup %2711 }
 0x9f4   :  { %1176 = vrot.lane.b32.xlu0 %v2712_v20, %s2966_s1  ;;  %v1166_v21 = vsub.f32 1.0, %v2712_v20  ;;  %v1169_v19 = vmul.f32 %v2712_v20, %v2218_v16  ;;  %v1165_v23 = vmul.f32 %v2712_v20, %v3220_v22  ;;  %v1173_v22 = vpop.permute.xlu0 %1172 }
 0x9f6   :  { %v1170_v24 = vmul.f32 %v1169_v19, %v1166_v21  ;;  %v3246_v25 = vadd.f32 %v1166_v21, %v1165_v23 }
 0x9f8   :  { %1180 = vrot.lane.b32.xlu0 %v1170_v24, %s2967_s24  ;;  %2451 = vmatmul.mubr.msk.f32.vlgmr.msra.gmra.mrb[10].mxu0 %vm103_vm2, %v3246_v25  ;;  %v1183_v27 = vsel %vm103_vm2, %v3246_v25, %v1173_v22  ;;  %v2222_v19 = vadd.f32 -1.0, %v3246_v25 }
 0x9f9   :  { %2615 = vmatpush3.bf16.msra.mxu0 %v3101_v5  ;;  %2472 = vmatprep.mubr.msk.f32.mxu0 %vm2964_vm0, %v2965_v1 }
 0x9fa   :  { %2616 = vmatprep.subr.bf16.mxu0 %v2963_v0 }
 0x9fd   :  { %2618 = vmatpush3.bf16.msra.mxu0 %v3108_v8 }
 0x9fe   :  { %2625 = vmatprep.subr.bf16.mxu0 %v2963_v0 }
 0xa66   :  { %v1177_v26 = vpop.permute.xlu0 %1176 }
 0xa67   :  { %v1184_v28 = vsel %vm315_vm3, %v1183_v27, %v1177_v26 }
 0xa6a   :  { %v1181_v29 = vpop.permute.xlu0 %1180 }
 0xa6b   :  { %v1185_v30 = vsel %vm317_vm4, %v1184_v28, %v1181_v29 }
 0xa6c   :  { %1187 = vst [vmem:[#allocation17 + $0x8] sm:$0x3] %v1185_v30 }
 0xacb   :  { %v1259_v32 = vpop.f32.mrb[10].mxu0 }
 0xacc   :  { %v1263_v33 = vadd.f32 %v1259_v32, %v1189_v31  ;;  %v2452_v34 = vpop.f32.mrb[11].mxu0 }
 0xacd   :  { %v1406_v34 = vld [vmem:[#allocation3 + $0xc] sm:$0x3] }
 0xace   :  { %v1264_v35 = vmul.f32 0.70710677, %v1263_v33  ;;  %v1295_v38 = vmul.f32 -0.5, %v1263_v33 }
 0xad0   :  { %v2220_v36 = vclamps-f32 %v1264_v35, 4.0  ;;  %v1296_v43 = vmul.f32 %v1295_v38, %v1263_v33 }
 0xad2   :  { %v1267_v37 = vmul.f32 %v2220_v36, %v2220_v36  ;;  %v1297_v51 = vmul.f32 1.442695, %v1296_v43 }
 0xad4   :  { %v1268_v39 = vmul.f32 %v1267_v37, %v1267_v37  ;;  %v1272_v40 = vmul.f32 -5.6925062e-05, %v1267_v37  ;;  %v1276_v41 = vmul.f32 2.7706815e-08, %v1267_v37  ;;  %v1284_v42 = vmul.f32 -0.00021337405, %v1267_v37 }
 0xad5   :  { %v1282_v45 = vmul.f32 -0.0073733293, %v1267_v37  ;;  %v1270_v52 = vmul.f32 -0.0029546006, %v1267_v37  ;;  %2713 = vpow2.f32 %v1297_v51 }
 0xad6   :  { %v1285_v44 = vadd.f32 -0.001682827, %v1284_v42  ;;  %v1286_v46 = vmul.f32 -1.45660715e-05, %v1268_v39  ;;  %v1273_v47 = vadd.f32 -0.00073499064, %v1272_v40  ;;  %v1269_v58 = vmul.f32 %v1268_v39, %v1268_v39 }
 0xad7   :  { %v1277_v48 = vadd.f32 -2.101024e-06, %v1276_v41  ;;  %v1278_v49 = vmul.f32 -2.7261424e-10, %v1268_v39  ;;  %v1283_v53 = vadd.f32 -0.014264739, %v1282_v45 }
 0xad8   :  { %v1287_v50 = vadd.f32 %v1286_v46, %v1285_v44  ;;  %v1274_v55 = vmul.f32 %v1273_v47, %v1268_v39  ;;  %v1271_v59 = vadd.f32 -0.016096033, %v1270_v52 }
 0xad9   :  { %v1279_v56 = vadd.f32 %v1278_v49, %v1277_v48 }
 0xada   :  { %v1288_v54 = vmul.f32 %v1287_v50, %v1268_v39  ;;  %v1275_v60 = vadd.f32 %v1274_v55, %v1271_v59 }
 0xadb   :  { %v1280_v61 = vmul.f32 %v1279_v56, %v1269_v58 }
 0xadc   :  { %v1289_v57 = vadd.f32 %v1288_v54, %v1283_v53 }
 0xadd   :  { %v1281_v62 = vadd.f32 %v1280_v61, %v1275_v60 }
 0xade   :  { %2715 = vrcp.f32 %v1289_v57 }
 0xadf   :  { %v2714_v63 = vpop.eup %2713  ;;  %v1290_v2 = vmul.f32 %v2220_v36, %v1281_v62 }
 0xae0   :  { %v1299_v6 = vmul.f32 0.3989423, %v2714_v63 }
 0xae2   :  { %v1301_v9 = vmul.f32 %v1299_v6, %v1263_v33 }
 0xae8   :  { %v2716_v3 = vpop.eup %2715 }
 0xae9   :  { %v1292_v4 = vmul.f32 %v2716_v3, %v1290_v2 }
 0xaeb   :  { %v1293_v7 = vadd.f32 1.0, %v1292_v4 }
 0xaed   :  { %v1294_v10 = vmul.f32 0.5, %v1293_v7 }
 0xaef   :  { %v1302_v12 = vadd.f32 %v1301_v9, %v1294_v10  ;;  %v1300_v14 = vmul.f32 %v1294_v10, %v1263_v33 }
 0xaf1   :  { %1389 = vrot.lane.b32.xlu1 %v1302_v12, %s2959_s2  ;;  %2462 = vmatmul.mubr.msk.f32.vlgmr.msra.gmra.mrb[10].mxu1 %vm103_vm2, %v1300_v14 }
 0xaf2   :  { %2621 = vmatpush3.bf16.msra.mxu1 %v3123_v13  ;;  %2483 = vmatprep.mubr.msk.f32.mxu1 %vm2964_vm0, %v2965_v1 }
 0xaf3   :  { %2622 = vmatprep.subr.bf16.mxu1 %v2963_v0 }
 0xaf6   :  { %2624 = vmatpush3.bf16.msra.mxu1 %v3126_v15 }
 0xaf7   :  { %2631 = vmatprep.subr.bf16.mxu1 %v2963_v0 }
 0xbc4   :  { %v1372_v11 = vpop.f32.mrb[10].mxu1 }
 0xbc5   :  { %v1376_v17 = vsub.f32 0.0, %v1372_v11  ;;  %v2463_v18 = vpop.f32.mrb[11].mxu1 }
 0xbc7   :  { %v1377_v16 = vmul.f32 1.442695, %v1376_v17 }
 0xbc9   :  { %2717 = vpow2.f32 %v1377_v16 }
 0xbd3   :  { %v2718_v20 = vpop.eup %2717 }
 0xbd4   :  { %v1379_v21 = vadd.f32 1.0, %v2718_v20 }
 0xbd6   :  { %2719 = vrcp.f32 %v1379_v21 }
 0xbe0   :  { %v2720_v23 = vpop.eup %2719 }
 0xbe1   :  { %1393 = vrot.lane.b32.xlu1 %v2720_v23, %s2966_s1  ;;  %v1383_v24 = vsub.f32 1.0, %v2720_v23  ;;  %v1386_v22 = vmul.f32 %v2720_v23, %v2222_v19  ;;  %v1382_v26 = vmul.f32 %v2720_v23, %v3246_v25  ;;  %v1390_v25 = vpop.permute.xlu1 %1389 }
 0xbe3   :  { %v1387_v27 = vmul.f32 %v1386_v22, %v1383_v24  ;;  %v3272_v28 = vadd.f32 %v1383_v24, %v1382_v26 }
 0xbe5   :  { %1397 = vrot.lane.b32.xlu1 %v1387_v27, %s2967_s24  ;;  %2473 = vmatmul.mubr.msk.f32.vlgmr.msra.gmra.mrb[12].mxu0 %vm103_vm2, %v3272_v28  ;;  %v1400_v30 = vsel %vm103_vm2, %v3272_v28, %v1390_v25  ;;  %v2226_v22 = vadd.f32 -1.0, %v3272_v28 }
 0xbe6   :  { %2627 = vmatpush3.bf16.msra.mxu0 %v3101_v5  ;;  %2494 = vmatprep.mubr.msk.f32.mxu0 %vm2964_vm0, %v2965_v1 }
 0xbe7   :  { %2628 = vmatprep.subr.bf16.mxu0 %v2963_v0 }
 0xbea   :  { %2630 = vmatpush3.bf16.msra.mxu0 %v3108_v8 }
 0xbeb   :  { %2637 = vmatprep.subr.bf16.mxu0 %v2963_v0 }
 0xc53   :  { %v1394_v29 = vpop.permute.xlu1 %1393 }
 0xc54   :  { %v1401_v31 = vsel %vm315_vm3, %v1400_v30, %v1394_v29 }
 0xc57   :  { %v1398_v32 = vpop.permute.xlu1 %1397 }
 0xc58   :  { %v1402_v33 = vsel %vm317_vm4, %v1401_v31, %v1398_v32 }
 0xc59   :  { %1404 = vst [vmem:[#allocation17 + $0xa] sm:$0x3] %v1402_v33 }
 0xcb8   :  { %v1476_v35 = vpop.f32.mrb[12].mxu0 }
 0xcb9   :  { %v1480_v36 = vadd.f32 %v1476_v35, %v1406_v34  ;;  %v2474_v37 = vpop.f32.mrb[13].mxu0 }
 0xcba   :  { %v1623_v37 = vld [vmem:[#allocation3 + $0xe] sm:$0x3] }
 0xcbb   :  { %v1481_v38 = vmul.f32 0.70710677, %v1480_v36  ;;  %v1512_v41 = vmul.f32 -0.5, %v1480_v36 }
 0xcbd   :  { %v2224_v39 = vclamps-f32 %v1481_v38, 4.0  ;;  %v1513_v46 = vmul.f32 %v1512_v41, %v1480_v36 }
 0xcbf   :  { %v1484_v40 = vmul.f32 %v2224_v39, %v2224_v39  ;;  %v1514_v54 = vmul.f32 1.442695, %v1513_v46 }
 0xcc1   :  { %v1485_v42 = vmul.f32 %v1484_v40, %v1484_v40  ;;  %v1489_v43 = vmul.f32 -5.6925062e-05, %v1484_v40  ;;  %v1493_v44 = vmul.f32 2.7706815e-08, %v1484_v40  ;;  %v1501_v45 = vmul.f32 -0.00021337405, %v1484_v40 }
 0xcc2   :  { %v1499_v48 = vmul.f32 -0.0073733293, %v1484_v40  ;;  %v1487_v55 = vmul.f32 -0.0029546006, %v1484_v40  ;;  %2721 = vpow2.f32 %v1514_v54 }
 0xcc3   :  { %v1502_v47 = vadd.f32 -0.001682827, %v1501_v45  ;;  %v1503_v49 = vmul.f32 -1.45660715e-05, %v1485_v42  ;;  %v1490_v50 = vadd.f32 -0.00073499064, %v1489_v43  ;;  %v1486_v61 = vmul.f32 %v1485_v42, %v1485_v42 }
 0xcc4   :  { %v1494_v51 = vadd.f32 -2.101024e-06, %v1493_v44  ;;  %v1495_v52 = vmul.f32 -2.7261424e-10, %v1485_v42  ;;  %v1500_v56 = vadd.f32 -0.014264739, %v1499_v48 }
 0xcc5   :  { %v1504_v53 = vadd.f32 %v1503_v49, %v1502_v47  ;;  %v1491_v58 = vmul.f32 %v1490_v50, %v1485_v42  ;;  %v1488_v62 = vadd.f32 -0.016096033, %v1487_v55 }
 0xcc6   :  { %v1496_v59 = vadd.f32 %v1495_v52, %v1494_v51 }
 0xcc7   :  { %v1505_v57 = vmul.f32 %v1504_v53, %v1485_v42  ;;  %v1492_v63 = vadd.f32 %v1491_v58, %v1488_v62 }
 0xcc8   :  { %v1497_v2 = vmul.f32 %v1496_v59, %v1486_v61 }
 0xcc9   :  { %v1506_v60 = vadd.f32 %v1505_v57, %v1500_v56 }
 0xcca   :  { %v1498_v3 = vadd.f32 %v1497_v2, %v1492_v63 }
 0xccb   :  { %2723 = vrcp.f32 %v1506_v60 }
 0xccc   :  { %v2722_v4 = vpop.eup %2721  ;;  %v1507_v6 = vmul.f32 %v2224_v39, %v1498_v3 }
 0xccd   :  { %v1516_v9 = vmul.f32 0.3989423, %v2722_v4 }
 0xccf   :  { %v1518_v11 = vmul.f32 %v1516_v9, %v1480_v36 }
 0xcd5   :  { %v2724_v7 = vpop.eup %2723 }
 0xcd6   :  { %v1509_v10 = vmul.f32 %v2724_v7, %v1507_v6 }
 0xcd8   :  { %v1510_v12 = vadd.f32 1.0, %v1509_v10 }
 0xcda   :  { %v1511_v14 = vmul.f32 0.5, %v1510_v12 }
 0xcdc   :  { %v1519_v17 = vadd.f32 %v1518_v11, %v1511_v14  ;;  %v1517_v18 = vmul.f32 %v1511_v14, %v1480_v36 }
 0xcde   :  { %1606 = vrot.lane.b32.xlu0 %v1519_v17, %s2959_s2  ;;  %2484 = vmatmul.mubr.msk.f32.vlgmr.msra.gmra.mrb[12].mxu1 %vm103_vm2, %v1517_v18 }
 0xcdf   :  { %2633 = vmatpush3.bf16.msra.mxu1 %v3123_v13  ;;  %2505 = vmatprep.mubr.msk.f32.mxu1 %vm2964_vm0, %v2965_v1 }
 0xce0   :  { %2634 = vmatprep.subr.bf16.mxu1 %v2963_v0 }
 0xce3   :  { %2636 = vmatpush3.bf16.msra.mxu1 %v3126_v15 }
 0xce4   :  { %2643 = vmatprep.subr.bf16.mxu1 %v2963_v0 }
 0xd50   :  { %v1607_v32 = vpop.permute.xlu0 %1606 }
 0xdb1   :  { %v1589_v16 = vpop.f32.mrb[12].mxu1 }
 0xdb2   :  { %v1593_v20 = vsub.f32 0.0, %v1589_v16  ;;  %v2485_v21 = vpop.f32.mrb[13].mxu1 }
 0xdb4   :  { %v1594_v19 = vmul.f32 1.442695, %v1593_v20 }
 0xdb6   :  { %2725 = vpow2.f32 %v1594_v19  ;;  %v1845_v19 = vld [vmem:[#allocation9] sm:$0xff] }
 0xdc0   :  { %v2726_v23 = vpop.eup %2725 }
 0xdc1   :  { %v1596_v24 = vadd.f32 1.0, %v2726_v23  ;;  %v1846_v23 = vld [vmem:[#allocation9 + $0x8] sm:$0xff] }
 0xdc3   :  { %2727 = vrcp.f32 %v1596_v24  ;;  %v2638_v24 = vpack.c.bf16 %v1846_v23, %v1845_v19 }
 0xdcd   :  { %v2728_v26 = vpop.eup %2727 }
 0xdce   :  { %1610 = vrot.lane.b32.xlu0 %v2728_v26, %s2966_s1  ;;  %v1600_v27 = vsub.f32 1.0, %v2728_v26  ;;  %v1603_v25 = vmul.f32 %v2728_v26, %v2226_v22  ;;  %v1599_v29 = vmul.f32 %v2728_v26, %v3272_v28  ;;  %v1847_v22 = vld [vmem:[#allocation9 + $0x10] sm:$0xff]  ;;  %v1848_v26 = vld [vmem:[#allocation9 + $0x18] sm:$0xff] }
 0xdd0   :  { %v1604_v30 = vmul.f32 %v1603_v25, %v1600_v27  ;;  %v3298_v31 = vadd.f32 %v1600_v27, %v1599_v29  ;;  %v2641_v27 = vpack.c.bf16 %v1848_v26, %v1847_v22 }
 0xdd2   :  { %1614 = vrot.lane.b32.xlu0 %v1604_v30, %s2967_s24  ;;  %2495 = vmatmul.mubr.msk.f32.vlgmr.msra.gmra.mrb[14].mxu0 %vm103_vm2, %v3298_v31  ;;  %v1617_v34 = vsel %vm103_vm2, %v3298_v31, %v1607_v32 }
 0xdd3   :  { %2516 = vmatprep.mubr.msk.f32.mxu0 %vm2964_vm0, %v2965_v1  ;;  %2639 = vmatpush3.bf16.msra.mxu0 %v2638_v24 }
 0xdd4   :  { %2640 = vmatprep.subr.bf16.mxu0 %v2963_v0 }
 0xdd7   :  { %2642 = vmatpush3.bf16.msra.mxu0 %v2641_v27 }
 0xdd8   :  { %2649 = vmatprep.subr.bf16.mxu0 %v2963_v0 }
 0xe40   :  { %v1611_v33 = vpop.permute.xlu0 %1610 }
 0xe41   :  { %v1618_v35 = vsel %vm315_vm3, %v1617_v34, %v1611_v33 }
 0xe44   :  { %v1615_v36 = vpop.permute.xlu0 %1614 }
 0xe45   :  { %v1619_v28 = vsel %vm317_vm4, %v1618_v35, %v1615_v36 }
 0xe46   :  { %1621 = vst [vmem:[#allocation17 + $0xc] sm:$0x3] %v1619_v28 }
 0xea5   :  { %v1693_v38 = vpop.f32.mrb[14].mxu0 }
 0xea6   :  { %v1697_v39 = vadd.f32 %v1693_v38, %v1623_v37  ;;  %v2496_v40 = vpop.f32.mrb[15].mxu0 }
 0xea8   :  { %v1698_v41 = vmul.f32 0.70710677, %v1697_v39  ;;  %v1729_v44 = vmul.f32 -0.5, %v1697_v39 }
 0xeaa   :  { %v2228_v42 = vclamps-f32 %v1698_v41, 4.0  ;;  %v1730_v49 = vmul.f32 %v1729_v44, %v1697_v39 }
 0xeac   :  { %v1701_v43 = vmul.f32 %v2228_v42, %v2228_v42  ;;  %v1731_v57 = vmul.f32 1.442695, %v1730_v49 }
 0xeae   :  { %v1702_v45 = vmul.f32 %v1701_v43, %v1701_v43  ;;  %v1706_v46 = vmul.f32 -5.6925062e-05, %v1701_v43  ;;  %v1710_v47 = vmul.f32 2.7706815e-08, %v1701_v43  ;;  %v1718_v48 = vmul.f32 -0.00021337405, %v1701_v43 }
 0xeaf   :  { %v1716_v51 = vmul.f32 -0.0073733293, %v1701_v43  ;;  %v1704_v58 = vmul.f32 -0.0029546006, %v1701_v43  ;;  %2729 = vpow2.f32 %v1731_v57 }
 0xeb0   :  { %v1719_v50 = vadd.f32 -0.001682827, %v1718_v48  ;;  %v1720_v52 = vmul.f32 -1.45660715e-05, %v1702_v45  ;;  %v1707_v53 = vadd.f32 -0.00073499064, %v1706_v46  ;;  %v1703_v2 = vmul.f32 %v1702_v45, %v1702_v45 }
 0xeb1   :  { %v1711_v54 = vadd.f32 -2.101024e-06, %v1710_v47  ;;  %v1712_v55 = vmul.f32 -2.7261424e-10, %v1702_v45  ;;  %v1717_v59 = vadd.f32 -0.014264739, %v1716_v51 }
 0xeb2   :  { %v1721_v56 = vadd.f32 %v1720_v52, %v1719_v50  ;;  %v1708_v61 = vmul.f32 %v1707_v53, %v1702_v45  ;;  %v1705_v3 = vadd.f32 -0.016096033, %v1704_v58 }
 0xeb3   :  { %v1713_v62 = vadd.f32 %v1712_v55, %v1711_v54 }
 0xeb4   :  { %v1722_v60 = vmul.f32 %v1721_v56, %v1702_v45  ;;  %v1709_v4 = vadd.f32 %v1708_v61, %v1705_v3 }
 0xeb5   :  { %v1714_v6 = vmul.f32 %v1713_v62, %v1703_v2 }
 0xeb6   :  { %v1723_v63 = vadd.f32 %v1722_v60, %v1717_v59 }
 0xeb7   :  { %v1715_v7 = vadd.f32 %v1714_v6, %v1709_v4 }
 0xeb8   :  { %2731 = vrcp.f32 %v1723_v63 }
 0xeb9   :  { %v2730_v10 = vpop.eup %2729  ;;  %v1724_v9 = vmul.f32 %v2228_v42, %v1715_v7 }
 0xeba   :  { %v1733_v11 = vmul.f32 0.3989423, %v2730_v10 }
 0xebc   :  { %v1735_v16 = vmul.f32 %v1733_v11, %v1697_v39 }
 0xec2   :  { %v2732_v12 = vpop.eup %2731 }
 0xec3   :  { %v1726_v14 = vmul.f32 %v2732_v12, %v1724_v9 }
 0xec5   :  { %v1727_v17 = vadd.f32 1.0, %v1726_v14 }
 0xec7   :  { %v1728_v18 = vmul.f32 0.5, %v1727_v17 }
 0xec9   :  { %v1736_v20 = vadd.f32 %v1735_v16, %v1728_v18  ;;  %v1734_v21 = vmul.f32 %v1728_v18, %v1697_v39 }
 0xecb   :  { %1823 = vrot.lane.b32.xlu1 %v1736_v20, %s2959_s2  ;;  %2506 = vmatmul.mubr.msk.f32.vlgmr.msra.gmra.mrb[14].mxu1 %vm103_vm2, %v1734_v21 }
 0xecc   :  { %2645 = vmatpush3.bf16.msra.mxu1 %v3101_v5  ;;  %2527 = vmatprep.mubr.msk.f32.mxu1 %vm2964_vm0, %v2965_v1 }
 0xecd   :  { %2646 = vmatprep.subr.bf16.mxu1 %v2963_v0 }
 0xed0   :  { %2648 = vmatpush3.bf16.msra.mxu1 %v3108_v8  ;;  %v2230_v8 = vadd.f32 -1.0, %v3298_v31 }
 0xf9e   :  { %v1806_v5 = vpop.f32.mrb[14].mxu1 }
 0xf9f   :  { %v1810_v25 = vsub.f32 0.0, %v1806_v5  ;;  %v2507_v29 = vpop.f32.mrb[15].mxu1 }
 0xfa1   :  { %v1811_v30 = vmul.f32 1.442695, %v1810_v25 }
 0xfa3   :  { %2733 = vpow2.f32 %v1811_v30 }
 0xfad   :  { %v2734_v32 = vpop.eup %2733 }
 0xfae   :  { %v1813_v33 = vadd.f32 1.0, %v2734_v32 }
 0xfb0   :  { %2735 = vrcp.f32 %v1813_v33 }
 0xfba   :  { %v2736_v34 = vpop.eup %2735 }
 0xfbb   :  { %1827 = vrot.lane.b32.xlu1 %v2736_v34, %s2966_s1  ;;  %v1817_v35 = vsub.f32 1.0, %v2736_v34  ;;  %v1820_v36 = vmul.f32 %v2736_v34, %v2230_v8  ;;  %v1816_v28 = vmul.f32 %v2736_v34, %v3298_v31  ;;  %v1824_v31 = vpop.permute.xlu1 %1823 }
 0xfbd   :  { %v1821_v37 = vmul.f32 %v1820_v36, %v1817_v35  ;;  %v3321_v38 = vadd.f32 %v1817_v35, %v1816_v28 }
 0xfbf   :  { %1831 = vrot.lane.b32.xlu1 %v1821_v37, %s2967_s24  ;;  %1840 = vst.msk [vmem:[#allocation2] sm:$0x3] %vm91_vm1, %v3321_v38  ;;  %1844 = vst.msk [vmem:[#allocation11] sm:$0x3] %vm91_vm1, %v3321_v38  ;;  %2517 = vmatmul.mubr.msk.f32.vlgmr.msra.gmra.mrb[16].mxu0 %vm103_vm2, %v3321_v38  ;;  %v1834_v40 = vsel %vm103_vm2, %v3321_v38, %v1824_v31 }
 0xfc0   :  { %2528 = vmatmul.mubr.msk.f32.vlgmr.msra.gmra.mrb[16].mxu1 %vm103_vm2, %v3321_v38  ;;  %2651 = vmatpush3.bf16.msra.mxu0 %v3123_v13  ;;  %v1930_v13 = vld [vmem:[#allocation3 + $0xe] sm:$0x3] }
 0xfc1   :  { %2652 = vmatprep.subr.bf16.mxu0 %v2963_v0  ;;  %2538 = vmatprep.mubr.msk.f32.mxu0 %vm2964_vm0, %v2965_v1  ;;  %v2231_v0 = vld [vmem:[%s3417_s5] ss:$0 sm:$0xff]  ;;  %s2968_s5 = smov [#allocation12]  }
 0xfc2   :  { %s2142_s30 = sshll.u32 %s2968_s5, 4  ;;  %s2143_s30 = int_to_ptr.vmem [resolvable:$true] %s2142_s30 }
 0xfc3   :  { %s2833_s13 = scalar_lea.vmem %s2143_s30, 32  ;;  %p2838_p5 = scmp.lt.s32.totalorder %s2143_s30, %s2143_s30 }
 0xfc4   :  { %2654 = vmatpush3.bf16.msra.mxu0 %v3126_v15  ;;  %p2834_p4 = scmp.ne.s32.totalorder %s2143_s30, %s2833_s13  ;;  %p2839_p6 = scmp.lt.s32.totalorder %s2833_s13, %s2833_s13 }
 0xfc6   :  { %p2840_p7 = por %p2839_p6, %p2838_p5 }
 0xfc8   :  { %p2841_p8 = pnand %p2840_p7, %p2834_p4 }
0x102d   :  { %v1828_v39 = vpop.permute.xlu1 %1827 }
0x102e   :  { %v1835_v41 = vsel %vm315_vm3, %v1834_v40, %v1828_v39 }
0x1031   :  { %v1832_v42 = vpop.permute.xlu1 %1831 }
0x1032   :  { %v1836_v43 = vsel %vm317_vm4, %v1835_v41, %v1832_v42 }
0x1033   :  { %1838 = vst [vmem:[#allocation17 + $0xe] sm:$0x3] %v1836_v43 }
0x1092   :  { %v1925_v44 = vpop.f32.mrb[16].mxu0 }
0x1093   :  { %v1926_v1 = vadd.f32 %v2231_v0, %v1925_v44  ;;  %v1997_v45 = vpop.f32.mrb[16].mxu1  ;;  %v2518_v15 = vpop.f32.mrb[17].mxu0 }
0x1094   :  { %v2001_v46 = vadd.f32 %v1997_v45, %v1930_v13  ;;  %v2529_v47 = vpop.f32.mrb[17].mxu1 }
0x1095   :  { %1929 = vst.msk [vmem:[#allocation12] sm:$0x3] %vm91_vm1, %v1926_v1 }
0x1096   :  { %v2002_v48 = vmul.f32 0.70710677, %v2001_v46  ;;  %v2033_v51 = vmul.f32 -0.5, %v2001_v46 }
0x1098   :  { %v2234_v49 = vclamps-f32 %v2002_v48, 4.0  ;;  %v2034_v56 = vmul.f32 %v2033_v51, %v2001_v46 }
0x109a   :  { %v2005_v50 = vmul.f32 %v2234_v49, %v2234_v49  ;;  %v2035_v2 = vmul.f32 1.442695, %v2034_v56 }
0x109c   :  { %v2006_v52 = vmul.f32 %v2005_v50, %v2005_v50  ;;  %v2010_v53 = vmul.f32 -5.6925062e-05, %v2005_v50  ;;  %v2014_v54 = vmul.f32 2.7706815e-08, %v2005_v50  ;;  %v2022_v55 = vmul.f32 -0.00021337405, %v2005_v50 }
0x109d   :  { %v2020_v58 = vmul.f32 -0.0073733293, %v2005_v50  ;;  %v2008_v3 = vmul.f32 -0.0029546006, %v2005_v50  ;;  %2737 = vpow2.f32 %v2035_v2 }
0x109e   :  { %v2023_v57 = vadd.f32 -0.001682827, %v2022_v55  ;;  %v2024_v59 = vmul.f32 -1.45660715e-05, %v2006_v52  ;;  %v2011_v60 = vadd.f32 -0.00073499064, %v2010_v53  ;;  %v2007_v12 = vmul.f32 %v2006_v52, %v2006_v52 }
0x109f   :  { %v2015_v61 = vadd.f32 -2.101024e-06, %v2014_v54  ;;  %v2016_v62 = vmul.f32 -2.7261424e-10, %v2006_v52  ;;  %v2021_v4 = vadd.f32 -0.014264739, %v2020_v58 }
0x10a0   :  { %v2025_v63 = vadd.f32 %v2024_v59, %v2023_v57  ;;  %v2012_v7 = vmul.f32 %v2011_v60, %v2006_v52  ;;  %v2009_v14 = vadd.f32 -0.016096033, %v2008_v3 }
0x10a1   :  { %v2017_v10 = vadd.f32 %v2016_v62, %v2015_v61 }
0x10a2   :  { %v2026_v6 = vmul.f32 %v2025_v63, %v2006_v52  ;;  %v2013_v11 = vadd.f32 %v2012_v7, %v2009_v14 }
0x10a3   :  { %v2018_v17 = vmul.f32 %v2017_v10, %v2007_v12 }
0x10a4   :  { %v2027_v9 = vadd.f32 %v2026_v6, %v2021_v4 }
0x10a5   :  { %v2019_v18 = vadd.f32 %v2018_v17, %v2013_v11 }
0x10a6   :  { %2739 = vrcp.f32 %v2027_v9 }
0x10a7   :  { %v2738_v16 = vpop.eup %2737  ;;  %v2028_v20 = vmul.f32 %v2234_v49, %v2019_v18 }
0x10a8   :  { %v2037_v23 = vmul.f32 0.3989423, %v2738_v16 }
0x10aa   :  { %v2039_v26 = vmul.f32 %v2037_v23, %v2001_v46 }
0x10b0   :  { %v2740_v21 = vpop.eup %2739 }
0x10b1   :  { %v2030_v19 = vmul.f32 %v2740_v21, %v2028_v20 }
0x10b3   :  { %v2031_v24 = vadd.f32 1.0, %v2030_v19 }
0x10b5   :  { %v2032_v22 = vmul.f32 0.5, %v2031_v24 }
0x10b7   :  { %v2038_v27 = vmul.f32 %v2032_v22, %v2001_v46  ;;  %v2040_v5 = vadd.f32 %v2039_v26, %v2032_v22 }
0x10b9   :  { %2539 = vmatmul.mubr.msk.f32.vlgmr.msra.gmra.mrb[18].mxu0 %vm103_vm2, %v2038_v27  ;;  %2125 = vst.msk [vmem:[#allocation15] sm:$0x3] %vm91_vm1, %v2040_v5 }
0x10ba   :  { %2844 = shalt.err (!%p2841_p8)
}
0x10bb   :  { %s2845_s15 = scalar_lea.hbm %s3419_s7, 32 }
0x10bc   :  { %p2846_p9 = scmp.ne.s32.totalorder %s3419_s7, %s2845_s15  ;;  %p2849_p10 = scmp.lt.u32.totalorder %s2845_s15, %s3419_s7 }
0x10be   :  { %p2851_p11 = pnand %p2849_p10, %p2846_p9 }
0x10c0   :  { %2854 = shalt.err (!%p2851_p11)
}
0x10c1   :  { %2145 = dma.vmem_to_hbm [thread:$0]  %s2143_s30, 32, %s3419_s7, [#allocation13]  }
0x10c2   :  { %s2855_s26 = scalar_lea.vmem %s2163_s12, 32  ;;  %p2860_p13 = scmp.lt.s32.totalorder %s2163_s12, %s2163_s12 }
0x10c3   :  { %p2856_p12 = scmp.ne.s32.totalorder %s2163_s12, %s2855_s26  ;;  %p2861_p0 = scmp.lt.s32.totalorder %s2855_s26, %s2855_s26 }
0x10c5   :  { %p2862_p1 = por %p2861_p0, %p2860_p13 }
0x10c7   :  { %p2863_p2 = pnand %p2862_p1, %p2856_p12 }
0x10c9   :  { %2866 = shalt.err (!%p2863_p2)
}
0x10ca   :  { %s2867_s21 = scalar_lea.hbm %s3421_s9, 32 }
0x10cb   :  { %p2868_p3 = scmp.ne.s32.totalorder %s3421_s9, %s2867_s21  ;;  %p2871_p4 = scmp.lt.u32.totalorder %s2867_s21, %s3421_s9 }
0x10cd   :  { %p2873_p5 = pnand %p2871_p4, %p2868_p3 }
0x10cf   :  { %2876 = shalt.err (!%p2873_p5)
}
0x10d0   :  { %2165 = dma.vmem_to_hbm [thread:$0]  %s2163_s12, 32, %s3421_s9, [#allocation16]  }
0x10d1   :  { %s2970_s29 = smov [#allocation11]  }
0x10d2   :  { %s2132_s5 = sshll.u32 %s2970_s29, 4  ;;  %s2133_s5 = int_to_ptr.vmem [resolvable:$true] %s2132_s5 }
0x10d3   :  { %s2877_s30 = scalar_lea.vmem %s2133_s5, 32  ;;  %p2882_p7 = scmp.lt.s32.totalorder %s2133_s5, %s2133_s5 }
0x10d4   :  { %p2878_p6 = scmp.ne.s32.totalorder %s2133_s5, %s2877_s30  ;;  %p2883_p8 = scmp.lt.s32.totalorder %s2877_s30, %s2877_s30 }
0x10d6   :  { %p2884_p9 = por %p2883_p8, %p2882_p7 }
0x10d8   :  { %p2885_p10 = pnand %p2884_p9, %p2878_p6 }
0x10da   :  { %2888 = shalt.err (!%p2885_p10)
}
0x10db   :  { %s2889_s0 = scalar_lea.hbm %s3418_s6, 32 }
0x10dc   :  { %p2890_p11 = scmp.ne.s32.totalorder %s3418_s6, %s2889_s0  ;;  %p2893_p12 = scmp.lt.u32.totalorder %s2889_s0, %s3418_s6 }
0x10de   :  { %p2895_p13 = pnand %p2893_p12, %p2890_p11 }
0x10e0   :  { %2898 = shalt.err (!%p2895_p13)
}
0x10e1   :  { %2135 = dma.vmem_to_hbm [thread:$0]  %s2133_s5, 32, %s3418_s6, [#allocation5]  }
0x10e2   :  { %s2971_s18 = smov [#allocation17]  }
0x10e3   :  { %s2171_s19 = sshll.u32 %s2971_s18, 4  ;;  %s2172_s19 = int_to_ptr.vmem [resolvable:$true] %s2171_s19 }
0x10e4   :  { %s2899_s20 = scalar_lea.vmem %s2172_s19, 256  ;;  %p2904_p1 = scmp.lt.s32.totalorder %s2172_s19, %s2172_s19 }
0x10e5   :  { %p2900_p0 = scmp.ne.s32.totalorder %s2172_s19, %s2899_s20  ;;  %p2905_p2 = scmp.lt.s32.totalorder %s2899_s20, %s2899_s20 }
0x10e7   :  { %p2906_p3 = por %p2905_p2, %p2904_p1 }
0x10e9   :  { %p2907_p4 = pnand %p2906_p3, %p2900_p0 }
0x10eb   :  { %2910 = shalt.err (!%p2907_p4)
}
0x10ec   :  { %s2911_s27 = scalar_lea.hbm %s3422_s10, 256 }
0x10ed   :  { %p2912_p5 = scmp.ne.s32.totalorder %s3422_s10, %s2911_s27  ;;  %p2915_p6 = scmp.lt.u32.totalorder %s2911_s27, %s3422_s10 }
0x10ef   :  { %p2917_p7 = pnand %p2915_p6, %p2912_p5 }
0x10f1   :  { %2920 = shalt.err (!%p2917_p7)
}
0x10f2   :  { %2177 = dma.vmem_to_hbm [thread:$0]  %s2172_s19, 256, %s3422_s10, [#allocation16], %s2959_s2, %s2959_s2, %s2960_s14   ;;  %v2236_v34 = vadd.f32 -1.0, %v3321_v38 }
0x10f3   :  { %s2972_s24 = smov [#allocation14]  }
0x10f4   :  { %s2152_s7 = sshll.u32 %s2972_s24, 4  ;;  %s2153_s7 = int_to_ptr.vmem [resolvable:$true] %s2152_s7 }
0x10f5   :  { %s2921_s10 = scalar_lea.vmem %s2153_s7, 32  ;;  %p2926_p9 = scmp.lt.s32.totalorder %s2153_s7, %s2153_s7 }
0x10f6   :  { %p2922_p8 = scmp.ne.s32.totalorder %s2153_s7, %s2921_s10  ;;  %p2927_p10 = scmp.lt.s32.totalorder %s2921_s10, %s2921_s10 }
0x10f8   :  { %p2928_p11 = por %p2927_p10, %p2926_p9 }
0x10fa   :  { %p2929_p12 = pnand %p2928_p11, %p2922_p8 }
0x118c   :  { %v2110_v25 = vpop.f32.mrb[18].mxu0 }
0x118d   :  { %v2114_v29 = vsub.f32 0.0, %v2110_v25  ;;  %v2540_v30 = vpop.f32.mrb[19].mxu0 }
0x118f   :  { %v2115_v32 = vmul.f32 1.442695, %v2114_v29 }
0x1191   :  { %2741 = vpow2.f32 %v2115_v32 }
0x119b   :  { %v2742_v33 = vpop.eup %2741 }
0x119c   :  { %v2117_v8 = vadd.f32 1.0, %v2742_v33 }
0x119e   :  { %2743 = vrcp.f32 %v2117_v8 }
0x11a8   :  { %v2744_v35 = vpop.eup %2743 }
0x11a9   :  { %v2121_v36 = vmul.f32 %v2744_v35, %v2236_v34  ;;  %v2122_v28 = vsub.f32 1.0, %v2744_v35 }
0x11ab   :  { %v2123_v37 = vmul.f32 %v2122_v28, %v2121_v36 }
0x11ad   :  { %2124 = vst.msk [vmem:[#allocation14] sm:$0x3] %vm91_vm1, %v2123_v37 }
0x11ae   :  { %2932 = shalt.err (!%p2929_p12)
}
0x11af   :  { %s2933_s25 = scalar_lea.hbm %s3420_s8, 32 }
0x11b0   :  { %p2934_p13 = scmp.ne.s32.totalorder %s3420_s8, %s2933_s25  ;;  %p2937_p0 = scmp.lt.u32.totalorder %s2933_s25, %s3420_s8 }
0x11b2   :  { %p2939_p1 = pnand %p2937_p0, %p2934_p13 }
0x11b4   :  { %2942 = shalt.err (!%p2939_p1)
}
0x11b5   :  { %2155 = dma.vmem_to_hbm [thread:$0]  %s2153_s7, 32, %s3420_s8, [#allocation13]  }
0x11b6   :  { %2949 = dma.done.wait [#allocation5], 32  }
0x11b7   :  { %2950 = vsyncadd [#allocation5], 4294967264 }
0x11b8   :  { %2951 = dma.done.wait [#allocation13], 64  }
0x11b9   :  { %2952 = vsyncadd [#allocation13], 4294967232 }
0x11ba   :  { %2953 = dma.done.wait [#allocation16], 288  }
0x11bb   :  { %2954 = vsyncadd [#allocation16], 4294967008 }
0x11bc   :  { %2193 = vsyncpa [#allocation4], 1 }
0x11bd   :  { %2194 = vsyncpa [#allocation7], 1 }
0x11be   :  { %2195 = vsyncpa [#allocation10], 1 }
0x11bf   :  { %2196 = vsyncpa [#allocation5], 1 }
0x11c0   :  { %2197 = vsyncpa [#allocation13], 1 }
0x11c1   :  { %2198 = vsyncpa [#allocation16], 1 }

</bundles_post_ra>
